<compile_context>
chip_gen: v7x
topology: tpu7x:2x2x1
jax: 0.10.0
libtpu: 0.0.40
codegen_flags: <defaults>
</compile_context>

<pallas_src>
import functools

import jax
import jax.numpy as jnp
from jax import lax
from jax.experimental import pallas as pl
from jax.experimental.pallas import tpu as pltpu


def _round_up(x, m):
    return ((x + m - 1) // m) * m


# ----------------------------------------------------------------------------
# Pallas kernel: one fused (batch, time) grid step of a ConvSimGRU layer.
# ----------------------------------------------------------------------------
def _convsimgru_cell_kernel(x_ref, w_ref, b_ref, out_ref, h_ref,
                            *, H, W, kh, kw):
    # x_ref  : (1, 1, Cin_pad, S)        bf16 input at (b, t)
    # w_ref  : (2*Chid, kh*kw*Ctot_pad)  bf16 im2col weights (i-rows * 0.5)
    # b_ref  : (2*Chid, 1)               f32 bias (i-rows * 0.5)
    # out_ref: (1, 1, Chid, S)           f32 hidden state at (b, t)
    # h_ref  : (Chid, S)                 f32 persistent VMEM hidden state
    S = H * W
    chid = h_ref.shape[0]
    ph, pw = kh // 2, kw // 2
    t = pl.program_id(1)

    @pl.when(t == 0)
    def _init():
        h_ref[...] = jnp.zeros_like(h_ref)

    x = x_ref[0, 0]                                   # (Cin_pad, S) bf16
    h = h_ref[...]                                    # (Chid, S)    f32

    comb = jnp.concatenate([x, h.astype(jnp.bfloat16)], axis=0)   # (Ctot, S)
    ctot = comb.shape[0]

    # Zero-pad along the flattened spatial (lane) axis so vertical taps read
    # zeros above/below the image; horizontal row-wrap is removed by masking.
    pad_w = ph * W + pw
    zpad = jnp.zeros((ctot, pad_w), jnp.bfloat16)
    wide = jnp.concatenate([zpad, comb, zpad], axis=1)  # (Ctot, S + 2*pad_w)

    # Column index of every output pixel (for horizontal-tap masks).
    px = lax.broadcasted_iota(jnp.int32, (1, S), 1) % W

    cols = []
    for ky in range(kh):
        for kx in range(kw):
            dy, dx = ky - ph, kx - pw
            off = dy * W + dx + pad_w                 # static, >= 0
            piece = wide[:, off:off + S]              # (Ctot, S)
            if dx != 0:
                valid = jnp.logical_and(px + dx >= 0, px + dx < W)
                piece = piece * jnp.where(valid, 1.0, 0.0).astype(piece.dtype)
            cols.append(piece)
    patch = jnp.concatenate(cols, axis=0)             # (kh*kw*Ctot, S) bf16

    # Single im2col matmul on the MXU, f32 accumulation.
    acc = jnp.dot(w_ref[...], patch,
                  preferred_element_type=jnp.float32)  # (2*Chid, S) f32
    acc = acc + b_ref[...]                             # lane-broadcast bias

    # One lane-dense tanh covers both gates (i-rows pre-scaled by 0.5).
    tt = jnp.tanh(acc)
    i_gate = 0.5 * tt[:chid, :] + 0.5                  # == sigmoid(cc_i)
    g_gate = tt[chid:, :]                              # == tanh(cc_g)

    h_next = h + i_gate * (g_gate - h)                 # i*g + (1-i)*h
    h_ref[...] = h_next
    out_ref[0, 0] = h_next


# ----------------------------------------------------------------------------
# One layer: a single pallas_call over grid (B, T)
# ----------------------------------------------------------------------------
def _convsimgru_layer(x_btcs, w_oihw, bias, H, W):
    """x_btcs: (B, T, Cin, H*W) float; w_oihw: (2*Chid, Cin+Chid, kh, kw);
    returns (B, T, Chid, H*W) float32 hidden states for every timestep."""
    B, T, cin, S = x_btcs.shape
    two_chid, ctot, kh, kw = w_oihw.shape
    chid = two_chid // 2
    assert ctot == cin + chid and S == H * W

    # Pad input channels to a multiple of 16 for clean bf16 sublane packing.
    cin_pad = _round_up(cin, 16)
    xk = jnp.pad(x_btcs, ((0, 0), (0, 0), (0, cin_pad - cin), (0, 0)))
    xk = xk.astype(jnp.bfloat16)
    ctot_pad = cin_pad + chid

    # OIHW -> (2*Chid, kh*kw*Ctot_pad) im2col weight (tap-major, then channel),
    # with the i-gate rows pre-scaled by 0.5 (sigmoid-via-tanh trick).
    w_ohwi = jnp.transpose(w_oihw, (0, 2, 3, 1))       # (2C, kh, kw, Ctot)
    w_x = jnp.pad(w_ohwi[..., :cin],
                  ((0, 0), (0, 0), (0, 0), (0, cin_pad - cin)))
    w_full = jnp.concatenate([w_x, w_ohwi[..., cin:]], axis=-1)
    gate_scale = jnp.concatenate([jnp.full((chid,), 0.5, jnp.float32),
                                  jnp.ones((chid,), jnp.float32)])
    w_full = w_full * gate_scale[:, None, None, None]
    w2 = w_full.reshape(two_chid, kh * kw * ctot_pad).astype(jnp.bfloat16)
    b2 = (bias * gate_scale).astype(jnp.float32).reshape(two_chid, 1)

    kernel = functools.partial(_convsimgru_cell_kernel, H=H, W=W, kh=kh, kw=kw)
    return pl.pallas_call(
        kernel,
        out_shape=jax.ShapeDtypeStruct((B, T, chid, S), jnp.float32),
        grid=(B, T),
        in_specs=[
            pl.BlockSpec((1, 1, cin_pad, S), lambda b, t: (b, t, 0, 0)),
            pl.BlockSpec((two_chid, kh * kw * ctot_pad), lambda b, t: (0, 0)),
            pl.BlockSpec((two_chid, 1), lambda b, t: (0, 0)),
        ],
        out_specs=pl.BlockSpec((1, 1, chid, S), lambda b, t: (b, t, 0, 0)),
        scratch_shapes=[pltpu.VMEM((chid, S), jnp.float32)],
        compiler_params=pltpu.CompilerParams(
            dimension_semantics=("parallel", "arbitrary")),
    )(xk, w2, b2)


# ----------------------------------------------------------------------------
# Full ConvSimGRU forward (layer loop is plain JAX glue)
# ----------------------------------------------------------------------------
def conv_sim_gru_forward(input_tensor, params, batch_first=False,
                         return_all_layers=False):
    """input_tensor: (T, B, C, H, W) if not batch_first else (B, T, C, H, W)."""
    x = input_tensor if batch_first else jnp.transpose(input_tensor,
                                                       (1, 0, 2, 3, 4))
    B, T, C, H, W = x.shape
    cur = x.reshape(B, T, C, H * W)          # channel-major, flat spatial

    layer_output_list = []
    last_state_list = []
    for (w, b) in params:
        cur = _convsimgru_layer(cur, w, b, H, W)       # (B, T, Chid, H*W)
        chid = cur.shape[2]
        layer_output_list.append(cur.reshape(B, T, chid, H, W))
        last_state_list.append([cur[:, -1].reshape(B, chid, H, W)])

    if not return_all_layers:
        return layer_output_list[-1], last_state_list[-1]
    return layer_output_list, last_state_list


# ----------------------------------------------------------------------------
# Pure-JAX f32 reference (correctness check only)
# ----------------------------------------------------------------------------
def _ref_forward(input_tensor, params, batch_first=False):
    x = input_tensor if batch_first else jnp.transpose(input_tensor,
                                                       (1, 0, 2, 3, 4))
    B, T, C, H, W = x.shape
    cur = x
    for (w, b) in params:
        chid = w.shape[0] // 2
        h = jnp.zeros((B, chid, H, W), jnp.float32)
        outs = []
        for t in range(T):
            comb = jnp.concatenate([cur[:, t], h], axis=1)
            cc = lax.conv_general_dilated(
                comb, w, window_strides=(1, 1), padding="SAME",
                dimension_numbers=("NCHW", "OIHW", "NCHW"))
            cc = cc + b[None, :, None, None]
            i = jax.nn.sigmoid(cc[:, :chid])
            g = jnp.tanh(cc[:, chid:])
            h = i * g + (1.0 - i) * h
            outs.append(h)
        cur = jnp.stack(outs, axis=1)
    return cur, [cur[:, -1]]


def init_params(key, input_dim, hidden_dims, kernel_sizes):
    """kaiming_normal(mode='fan_out') conv weights, zero bias (per init_weights)."""
    params = []
    in_dim = input_dim
    for chid, (kh, kw) in zip(hidden_dims, kernel_sizes):
        cout = 2 * chid
        std = (2.0 / (cout * kh * kw)) ** 0.5
        key, sub = jax.random.split(key)
        w = std * jax.random.normal(sub, (cout, in_dim + chid, kh, kw),
                                    jnp.float32)       # OIHW, in = [x, h]
        b = jnp.zeros((cout,), jnp.float32)
        params.append((w, b))
        in_dim = chid
    return params


if __name__ == "__main__":
    # ConvSimGRU(input_size=(16,16), input_dim=4, hidden_dim=32,
    #            kernel_size=(3,3), num_layers=2, batch_first=False, bias=True)
    T, B, C, H, W = 8, 2, 4, 16, 16
    hidden_dims = [32, 32]
    kernel_sizes = [(3, 3), (3, 3)]

    key = jax.random.PRNGKey(0)
    kx, kp = jax.random.split(key)
    x = jax.random.normal(kx, (T, B, C, H, W), jnp.float32)   # (t, b, c, h, w)
    params = init_params(kp, C, hidden_dims, kernel_sizes)

    fwd = jax.jit(functools.partial(conv_sim_gru_forward, batch_first=False,
                                    return_all_layers=False))
    layer_out, last_state = fwd(x, params)
    jax.block_until_ready((layer_out, last_state))

    # correctness check (kernel matmuls run in bf16 -> relaxed tolerance)
    ref_out, ref_last = _ref_forward(x, params, batch_first=False)
    assert layer_out.shape == (B, T, hidden_dims[-1], H, W)
    assert last_state[0].shape == (B, hidden_dims[-1], H, W)
    err = jnp.abs(layer_out - ref_out)
    max_err = float(jnp.max(err))
    mean_err = float(jnp.mean(err))
    last_err = float(jnp.max(jnp.abs(last_state[0] - ref_last[0])))
    assert max_err < 1e-1, f"layer output max err: {max_err}"
    assert mean_err < 1e-2, f"layer output mean err: {mean_err}"
    assert last_err < 1e-1, f"last state max err: {last_err}"

    print("KERNEL_OK")
</pallas_src>

<mosaic_0001>
module attributes {stable_mosaic.version = 11 : i64} {
  func.func @_convsimgru_cell_kernel(%arg0: i32, %arg1: i32, %arg2: memref<1x1x16x256xbf16, #tpu.memory_space<vmem>>, %arg3: memref<64x432xbf16, #tpu.memory_space<vmem>>, %arg4: memref<64x1xf32, #tpu.memory_space<vmem>>, %arg5: memref<1x1x32x256xf32, #tpu.memory_space<vmem>>, %arg6: memref<32x256xf32, #tpu.memory_space<vmem>>) attributes {dimension_semantics = [#tpu.dimension_semantics<parallel>, #tpu.dimension_semantics<arbitrary>], iteration_bounds = array<i64: 2, 8>, scalar_prefetch = 0 : i64, scratch_operands = 1 : i64, tpu.core_type = #tpu.core_type<tc>, window_params = [{transform_indices = @transform_0, window_bounds = array<i64: 1, 1, 16, 256>}, {pipeline_mode = #tpu.pipeline_mode<synchronous>, transform_indices = @transform_1, window_bounds = array<i64: 64, 432>}, {pipeline_mode = #tpu.pipeline_mode<synchronous>, transform_indices = @transform_2, window_bounds = array<i64: 64, 1>}, {transform_indices = @transform_3, window_bounds = array<i64: 1, 1, 32, 256>}]} {
    %c0_i32 = arith.constant 0 : i32
    %0 = arith.cmpi eq, %arg1, %c0_i32 : i32
    %1 = arith.extui %0 : i1 to i32
    %c0_i32_0 = arith.constant 0 : i32
    %2 = arith.cmpi ne, %1, %c0_i32_0 : i32
    scf.if %2 {
      %cst_58 = arith.constant 0.000000e+00 : f32
      %146 = vector.broadcast %cst_58 : f32 to vector<32x256xf32>
      %c0_59 = arith.constant 0 : index
      %c0_60 = arith.constant 0 : index
      %147 = vector.load %arg6[%c0_59, %c0_60] : memref<32x256xf32, #tpu.memory_space<vmem>>, vector<32x256xf32>
      tpu.vector_store %arg6[%c0_59, %c0_60], %146 {strides = array<i32>} : memref<32x256xf32, #tpu.memory_space<vmem>>, vector<32x256xf32>,
    } else {
    }
    %c0 = arith.constant 0 : index
    %c0_1 = arith.constant 0 : index
    %c0_2 = arith.constant 0 : index
    %c0_3 = arith.constant 0 : index
    %3 = vector.load %arg2[%c0, %c0_1, %c0_2, %c0_3] : memref<1x1x16x256xbf16, #tpu.memory_space<vmem>>, vector<1x1x16x256xbf16>
    %4 = vector.shape_cast %3 : vector<1x1x16x256xbf16> to vector<16x256xbf16>
    %c0_4 = arith.constant 0 : index
    %c0_5 = arith.constant 0 : index
    %5 = vector.load %arg6[%c0_4, %c0_5] : memref<32x256xf32, #tpu.memory_space<vmem>>, vector<32x256xf32>
    %6 = arith.truncf %5 : vector<32x256xf32> to vector<32x256xbf16>
    %7 = tpu.concatenate %4, %6 in 0 : vector<16x256xbf16>, vector<32x256xbf16> -> vector<48x256xbf16>
    %cst = arith.constant 0.000000e+00 : bf16
    %8 = vector.broadcast %cst : bf16 to vector<48x17xbf16>
    %9 = tpu.concatenate %8, %7, %8 in 1 : vector<48x17xbf16>, vector<48x256xbf16>, vector<48x17xbf16> -> vector<48x290xbf16>
    %10 = tpu.iota {dimensions = array<i32: 1>} : vector<1x256xi32>
    %c16_i32 = arith.constant 16 : i32
    %c0_i32_6 = arith.constant 0 : i32
    %11 = arith.cmpi eq, %c16_i32, %c0_i32_6 : i32
    %c1_i32 = arith.constant 1 : i32
    %12 = arith.select %11, %c1_i32, %c16_i32 : i32
    %13 = vector.broadcast %12 : i32 to vector<1x256xi32>
    %14 = arith.remsi %10, %13 : vector<1x256xi32>
    %c0_i32_7 = arith.constant 0 : i32
    %15 = vector.broadcast %c0_i32_7 : i32 to vector<1x256xi32>
    %16 = arith.cmpi ne, %14, %15 : vector<1x256xi32>
    %c0_i32_8 = arith.constant 0 : i32
    %17 = vector.broadcast %c0_i32_8 : i32 to vector<1x256xi32>
    %18 = arith.cmpi slt, %14, %17 : vector<1x256xi32>
    %c0_i32_9 = arith.constant 0 : i32
    %19 = arith.cmpi slt, %12, %c0_i32_9 : i32
    %20 = vector.broadcast %19 : i1 to vector<1x256xi1>
    %21 = vector.broadcast %20 : vector<1x256xi1> to vector<1x256xi1>
    %22 = arith.xori %18, %21 : vector<1x256xi1>
    %23 = arith.andi %22, %16 : vector<1x256xi1>
    %24 = vector.broadcast %12 : i32 to vector<1x256xi32>
    %25 = arith.addi %14, %24 : vector<1x256xi32>
    %26 = arith.select %23, %25, %14 : vector<1x256xi1>, vector<1x256xi32>
    %27 = vector.extract_strided_slice %9 {offsets = [0, 0], sizes = [48, 256], strides = [1, 1]} : vector<48x290xbf16> to vector<48x256xbf16>
    %c-1_i32 = arith.constant -1 : i32
    %28 = vector.broadcast %c-1_i32 : i32 to vector<1x256xi32>
    %29 = arith.addi %26, %28 : vector<1x256xi32>
    %c0_i32_10 = arith.constant 0 : i32
    %30 = vector.broadcast %c0_i32_10 : i32 to vector<1x256xi32>
    %31 = arith.cmpi sge, %29, %30 : vector<1x256xi32>
    %c-1_i32_11 = arith.constant -1 : i32
    %32 = vector.broadcast %c-1_i32_11 : i32 to vector<1x256xi32>
    %33 = arith.addi %26, %32 : vector<1x256xi32>
    %c16_i32_12 = arith.constant 16 : i32
    %34 = vector.broadcast %c16_i32_12 : i32 to vector<1x256xi32>
    %35 = arith.cmpi slt, %33, %34 : vector<1x256xi32>
    %36 = arith.andi %31, %35 : vector<1x256xi1>
    %cst_13 = arith.constant 1.000000e+00 : f32
    %cst_14 = arith.constant 0.000000e+00 : f32
    %37 = vector.broadcast %cst_13 : f32 to vector<1x256xf32>
    %38 = vector.broadcast %cst_14 : f32 to vector<1x256xf32>
    %39 = arith.select %36, %37, %38 : vector<1x256xi1>, vector<1x256xf32>
    %40 = arith.truncf %39 : vector<1x256xf32> to vector<1x256xbf16>
    %41 = vector.broadcast %40 : vector<1x256xbf16> to vector<48x256xbf16>
    %42 = arith.mulf %27, %41 : vector<48x256xbf16>
    %43 = vector.extract_strided_slice %9 {offsets = [0, 1], sizes = [48, 256], strides = [1, 1]} : vector<48x290xbf16> to vector<48x256xbf16>
    %44 = vector.extract_strided_slice %9 {offsets = [0, 2], sizes = [48, 256], strides = [1, 1]} : vector<48x290xbf16> to vector<48x256xbf16>
    %c1_i32_15 = arith.constant 1 : i32
    %45 = vector.broadcast %c1_i32_15 : i32 to vector<1x256xi32>
    %46 = arith.addi %26, %45 : vector<1x256xi32>
    %c0_i32_16 = arith.constant 0 : i32
    %47 = vector.broadcast %c0_i32_16 : i32 to vector<1x256xi32>
    %48 = arith.cmpi sge, %46, %47 : vector<1x256xi32>
    %c1_i32_17 = arith.constant 1 : i32
    %49 = vector.broadcast %c1_i32_17 : i32 to vector<1x256xi32>
    %50 = arith.addi %26, %49 : vector<1x256xi32>
    %c16_i32_18 = arith.constant 16 : i32
    %51 = vector.broadcast %c16_i32_18 : i32 to vector<1x256xi32>
    %52 = arith.cmpi slt, %50, %51 : vector<1x256xi32>
    %53 = arith.andi %48, %52 : vector<1x256xi1>
    %cst_19 = arith.constant 1.000000e+00 : f32
    %cst_20 = arith.constant 0.000000e+00 : f32
    %54 = vector.broadcast %cst_19 : f32 to vector<1x256xf32>
    %55 = vector.broadcast %cst_20 : f32 to vector<1x256xf32>
    %56 = arith.select %53, %54, %55 : vector<1x256xi1>, vector<1x256xf32>
    %57 = arith.truncf %56 : vector<1x256xf32> to vector<1x256xbf16>
    %58 = vector.broadcast %57 : vector<1x256xbf16> to vector<48x256xbf16>
    %59 = arith.mulf %44, %58 : vector<48x256xbf16>
    %60 = vector.extract_strided_slice %9 {offsets = [0, 16], sizes = [48, 256], strides = [1, 1]} : vector<48x290xbf16> to vector<48x256xbf16>
    %c-1_i32_21 = arith.constant -1 : i32
    %61 = vector.broadcast %c-1_i32_21 : i32 to vector<1x256xi32>
    %62 = arith.addi %26, %61 : vector<1x256xi32>
    %c0_i32_22 = arith.constant 0 : i32
    %63 = vector.broadcast %c0_i32_22 : i32 to vector<1x256xi32>
    %64 = arith.cmpi sge, %62, %63 : vector<1x256xi32>
    %c-1_i32_23 = arith.constant -1 : i32
    %65 = vector.broadcast %c-1_i32_23 : i32 to vector<1x256xi32>
    %66 = arith.addi %26, %65 : vector<1x256xi32>
    %c16_i32_24 = arith.constant 16 : i32
    %67 = vector.broadcast %c16_i32_24 : i32 to vector<1x256xi32>
    %68 = arith.cmpi slt, %66, %67 : vector<1x256xi32>
    %69 = arith.andi %64, %68 : vector<1x256xi1>
    %cst_25 = arith.constant 1.000000e+00 : f32
    %cst_26 = arith.constant 0.000000e+00 : f32
    %70 = vector.broadcast %cst_25 : f32 to vector<1x256xf32>
    %71 = vector.broadcast %cst_26 : f32 to vector<1x256xf32>
    %72 = arith.select %69, %70, %71 : vector<1x256xi1>, vector<1x256xf32>
    %73 = arith.truncf %72 : vector<1x256xf32> to vector<1x256xbf16>
    %74 = vector.broadcast %73 : vector<1x256xbf16> to vector<48x256xbf16>
    %75 = arith.mulf %60, %74 : vector<48x256xbf16>
    %76 = vector.extract_strided_slice %9 {offsets = [0, 17], sizes = [48, 256], strides = [1, 1]} : vector<48x290xbf16> to vector<48x256xbf16>
    %77 = vector.extract_strided_slice %9 {offsets = [0, 18], sizes = [48, 256], strides = [1, 1]} : vector<48x290xbf16> to vector<48x256xbf16>
    %c1_i32_27 = arith.constant 1 : i32
    %78 = vector.broadcast %c1_i32_27 : i32 to vector<1x256xi32>
    %79 = arith.addi %26, %78 : vector<1x256xi32>
    %c0_i32_28 = arith.constant 0 : i32
    %80 = vector.broadcast %c0_i32_28 : i32 to vector<1x256xi32>
    %81 = arith.cmpi sge, %79, %80 : vector<1x256xi32>
    %c1_i32_29 = arith.constant 1 : i32
    %82 = vector.broadcast %c1_i32_29 : i32 to vector<1x256xi32>
    %83 = arith.addi %26, %82 : vector<1x256xi32>
    %c16_i32_30 = arith.constant 16 : i32
    %84 = vector.broadcast %c16_i32_30 : i32 to vector<1x256xi32>
    %85 = arith.cmpi slt, %83, %84 : vector<1x256xi32>
    %86 = arith.andi %81, %85 : vector<1x256xi1>
    %cst_31 = arith.constant 1.000000e+00 : f32
    %cst_32 = arith.constant 0.000000e+00 : f32
    %87 = vector.broadcast %cst_31 : f32 to vector<1x256xf32>
    %88 = vector.broadcast %cst_32 : f32 to vector<1x256xf32>
    %89 = arith.select %86, %87, %88 : vector<1x256xi1>, vector<1x256xf32>
    %90 = arith.truncf %89 : vector<1x256xf32> to vector<1x256xbf16>
    %91 = vector.broadcast %90 : vector<1x256xbf16> to vector<48x256xbf16>
    %92 = arith.mulf %77, %91 : vector<48x256xbf16>
    %93 = vector.extract_strided_slice %9 {offsets = [0, 32], sizes = [48, 256], strides = [1, 1]} : vector<48x290xbf16> to vector<48x256xbf16>
    %c-1_i32_33 = arith.constant -1 : i32
    %94 = vector.broadcast %c-1_i32_33 : i32 to vector<1x256xi32>
    %95 = arith.addi %26, %94 : vector<1x256xi32>
    %c0_i32_34 = arith.constant 0 : i32
    %96 = vector.broadcast %c0_i32_34 : i32 to vector<1x256xi32>
    %97 = arith.cmpi sge, %95, %96 : vector<1x256xi32>
    %c-1_i32_35 = arith.constant -1 : i32
    %98 = vector.broadcast %c-1_i32_35 : i32 to vector<1x256xi32>
    %99 = arith.addi %26, %98 : vector<1x256xi32>
    %c16_i32_36 = arith.constant 16 : i32
    %100 = vector.broadcast %c16_i32_36 : i32 to vector<1x256xi32>
    %101 = arith.cmpi slt, %99, %100 : vector<1x256xi32>
    %102 = arith.andi %97, %101 : vector<1x256xi1>
    %cst_37 = arith.constant 1.000000e+00 : f32
    %cst_38 = arith.constant 0.000000e+00 : f32
    %103 = vector.broadcast %cst_37 : f32 to vector<1x256xf32>
    %104 = vector.broadcast %cst_38 : f32 to vector<1x256xf32>
    %105 = arith.select %102, %103, %104 : vector<1x256xi1>, vector<1x256xf32>
    %106 = arith.truncf %105 : vector<1x256xf32> to vector<1x256xbf16>
    %107 = vector.broadcast %106 : vector<1x256xbf16> to vector<48x256xbf16>
    %108 = arith.mulf %93, %107 : vector<48x256xbf16>
    %109 = vector.extract_strided_slice %9 {offsets = [0, 33], sizes = [48, 256], strides = [1, 1]} : vector<48x290xbf16> to vector<48x256xbf16>
    %110 = vector.extract_strided_slice %9 {offsets = [0, 34], sizes = [48, 256], strides = [1, 1]} : vector<48x290xbf16> to vector<48x256xbf16>
    %c1_i32_39 = arith.constant 1 : i32
    %111 = vector.broadcast %c1_i32_39 : i32 to vector<1x256xi32>
    %112 = arith.addi %26, %111 : vector<1x256xi32>
    %c0_i32_40 = arith.constant 0 : i32
    %113 = vector.broadcast %c0_i32_40 : i32 to vector<1x256xi32>
    %114 = arith.cmpi sge, %112, %113 : vector<1x256xi32>
    %c1_i32_41 = arith.constant 1 : i32
    %115 = vector.broadcast %c1_i32_41 : i32 to vector<1x256xi32>
    %116 = arith.addi %26, %115 : vector<1x256xi32>
    %c16_i32_42 = arith.constant 16 : i32
    %117 = vector.broadcast %c16_i32_42 : i32 to vector<1x256xi32>
    %118 = arith.cmpi slt, %116, %117 : vector<1x256xi32>
    %119 = arith.andi %114, %118 : vector<1x256xi1>
    %cst_43 = arith.constant 1.000000e+00 : f32
    %cst_44 = arith.constant 0.000000e+00 : f32
    %120 = vector.broadcast %cst_43 : f32 to vector<1x256xf32>
    %121 = vector.broadcast %cst_44 : f32 to vector<1x256xf32>
    %122 = arith.select %119, %120, %121 : vector<1x256xi1>, vector<1x256xf32>
    %123 = arith.truncf %122 : vector<1x256xf32> to vector<1x256xbf16>
    %124 = vector.broadcast %123 : vector<1x256xbf16> to vector<48x256xbf16>
    %125 = arith.mulf %110, %124 : vector<48x256xbf16>
    %126 = tpu.concatenate %42, %43, %59, %75, %76, %92, %108, %109, %125 in 0 : vector<48x256xbf16>, vector<48x256xbf16>, vector<48x256xbf16>, vector<48x256xbf16>, vector<48x256xbf16>, vector<48x256xbf16>, vector<48x256xbf16>, vector<48x256xbf16>, vector<48x256xbf16> -> vector<432x256xbf16>
    %c0_45 = arith.constant 0 : index
    %c0_46 = arith.constant 0 : index
    %127 = vector.load %arg3[%c0_45, %c0_46] : memref<64x432xbf16, #tpu.memory_space<vmem>>, vector<64x432xbf16>
    %cst_47 = arith.constant dense<0.000000e+00> : vector<64x256xf32>
    %128 = tpu.matmul %127, %126, %cst_47 {dimension_numbers = #tpu.dot_dimension_numbers<[1], [0], [0], [1], [0, 0, 1, 1], [], []>} : vector<64x432xbf16>, vector<432x256xbf16>, vector<64x256xf32> -> vector<64x256xf32>
    %c0_48 = arith.constant 0 : index
    %c0_49 = arith.constant 0 : index
    %129 = vector.load %arg4[%c0_48, %c0_49] : memref<64x1xf32, #tpu.memory_space<vmem>>, vector<64x1xf32>
    %130 = vector.broadcast %129 : vector<64x1xf32> to vector<64x256xf32>
    %131 = arith.addf %128, %130 : vector<64x256xf32>
    %132 = math.tanh %131 : vector<64x256xf32>
    %133 = vector.extract_strided_slice %132 {offsets = [0, 0], sizes = [32, 256], strides = [1, 1]} : vector<64x256xf32> to vector<32x256xf32>
    %cst_50 = arith.constant 5.000000e-01 : f32
    %134 = vector.broadcast %cst_50 : f32 to vector<32x256xf32>
    %135 = arith.mulf %134, %133 : vector<32x256xf32>
    %cst_51 = arith.constant 5.000000e-01 : f32
    %136 = vector.broadcast %cst_51 : f32 to vector<32x256xf32>
    %137 = arith.addf %135, %136 : vector<32x256xf32>
    %138 = vector.extract_strided_slice %132 {offsets = [32, 0], sizes = [32, 256], strides = [1, 1]} : vector<64x256xf32> to vector<32x256xf32>
    %139 = arith.subf %138, %5 : vector<32x256xf32>
    %140 = arith.mulf %137, %139 : vector<32x256xf32>
    %141 = arith.addf %5, %140 : vector<32x256xf32>
    %c0_52 = arith.constant 0 : index
    %c0_53 = arith.constant 0 : index
    %142 = vector.load %arg6[%c0_52, %c0_53] : memref<32x256xf32, #tpu.memory_space<vmem>>, vector<32x256xf32>
    tpu.vector_store %arg6[%c0_52, %c0_53], %141 {strides = array<i32>} : memref<32x256xf32, #tpu.memory_space<vmem>>, vector<32x256xf32>,
    %c0_54 = arith.constant 0 : index
    %c0_55 = arith.constant 0 : index
    %c0_56 = arith.constant 0 : index
    %c0_57 = arith.constant 0 : index
    %143 = vector.load %arg5[%c0_54, %c0_55, %c0_56, %c0_57] : memref<1x1x32x256xf32, #tpu.memory_space<vmem>>, vector<1x1x32x256xf32>
    %144 = vector.shape_cast %143 : vector<1x1x32x256xf32> to vector<32x256xf32>
    %145 = vector.shape_cast %141 : vector<32x256xf32> to vector<1x1x32x256xf32>
    tpu.vector_store %arg5[%c0_54, %c0_55, %c0_56, %c0_57], %145 {strides = array<i32>} : memref<1x1x32x256xf32, #tpu.memory_space<vmem>>, vector<1x1x32x256xf32>,
    return
  }
  func.func @transform_0(%arg0: i32, %arg1: i32) -> (i32, i32, i32, i32) {
    %c0_i32 = arith.constant 0 : i32
    %c0_i32_0 = arith.constant 0 : i32
    %c0_i32_1 = arith.constant 0 : i32
    return %arg0, %arg1, %c0_i32, %c0_i32_0 : i32, i32, i32, i32
  }
  func.func @transform_1(%arg0: i32, %arg1: i32) -> (i32, i32) {
    %c0_i32 = arith.constant 0 : i32
    %c0_i32_0 = arith.constant 0 : i32
    %c0_i32_1 = arith.constant 0 : i32
    return %c0_i32, %c0_i32_0 : i32, i32
  }
  func.func @transform_2(%arg0: i32, %arg1: i32) -> (i32, i32) {
    %c0_i32 = arith.constant 0 : i32
    %c0_i32_0 = arith.constant 0 : i32
    %c0_i32_1 = arith.constant 0 : i32
    return %c0_i32, %c0_i32_0 : i32, i32
  }
  func.func @transform_3(%arg0: i32, %arg1: i32) -> (i32, i32, i32, i32) {
    %c0_i32 = arith.constant 0 : i32
    %c0_i32_0 = arith.constant 0 : i32
    %c0_i32_1 = arith.constant 0 : i32
    return %arg0, %arg1, %c0_i32, %c0_i32_0 : i32, i32, i32, i32
  }
}

module attributes {stable_mosaic.version = 11 : i64} {
  func.func @_convsimgru_cell_kernel(%arg0: i32, %arg1: i32, %arg2: memref<1x1x32x256xbf16, #tpu.memory_space<vmem>>, %arg3: memref<64x576xbf16, #tpu.memory_space<vmem>>, %arg4: memref<64x1xf32, #tpu.memory_space<vmem>>, %arg5: memref<1x1x32x256xf32, #tpu.memory_space<vmem>>, %arg6: memref<32x256xf32, #tpu.memory_space<vmem>>) attributes {dimension_semantics = [#tpu.dimension_semantics<parallel>, #tpu.dimension_semantics<arbitrary>], iteration_bounds = array<i64: 2, 8>, scalar_prefetch = 0 : i64, scratch_operands = 1 : i64, tpu.core_type = #tpu.core_type<tc>, window_params = [{transform_indices = @transform_0, window_bounds = array<i64: 1, 1, 32, 256>}, {pipeline_mode = #tpu.pipeline_mode<synchronous>, transform_indices = @transform_1, window_bounds = array<i64: 64, 576>}, {pipeline_mode = #tpu.pipeline_mode<synchronous>, transform_indices = @transform_2, window_bounds = array<i64: 64, 1>}, {transform_indices = @transform_3, window_bounds = array<i64: 1, 1, 32, 256>}]} {
    %c0_i32 = arith.constant 0 : i32
    %0 = arith.cmpi eq, %arg1, %c0_i32 : i32
    %1 = arith.extui %0 : i1 to i32
    %c0_i32_0 = arith.constant 0 : i32
    %2 = arith.cmpi ne, %1, %c0_i32_0 : i32
    scf.if %2 {
      %cst_58 = arith.constant 0.000000e+00 : f32
      %146 = vector.broadcast %cst_58 : f32 to vector<32x256xf32>
      %c0_59 = arith.constant 0 : index
      %c0_60 = arith.constant 0 : index
      %147 = vector.load %arg6[%c0_59, %c0_60] : memref<32x256xf32, #tpu.memory_space<vmem>>, vector<32x256xf32>
      tpu.vector_store %arg6[%c0_59, %c0_60], %146 {strides = array<i32>} : memref<32x256xf32, #tpu.memory_space<vmem>>, vector<32x256xf32>,
    } else {
    }
    %c0 = arith.constant 0 : index
    %c0_1 = arith.constant 0 : index
    %c0_2 = arith.constant 0 : index
    %c0_3 = arith.constant 0 : index
    %3 = vector.load %arg2[%c0, %c0_1, %c0_2, %c0_3] : memref<1x1x32x256xbf16, #tpu.memory_space<vmem>>, vector<1x1x32x256xbf16>
    %4 = vector.shape_cast %3 : vector<1x1x32x256xbf16> to vector<32x256xbf16>
    %c0_4 = arith.constant 0 : index
    %c0_5 = arith.constant 0 : index
    %5 = vector.load %arg6[%c0_4, %c0_5] : memref<32x256xf32, #tpu.memory_space<vmem>>, vector<32x256xf32>
    %6 = arith.truncf %5 : vector<32x256xf32> to vector<32x256xbf16>
    %7 = tpu.concatenate %4, %6 in 0 : vector<32x256xbf16>, vector<32x256xbf16> -> vector<64x256xbf16>
    %cst = arith.constant 0.000000e+00 : bf16
    %8 = vector.broadcast %cst : bf16 to vector<64x17xbf16>
    %9 = tpu.concatenate %8, %7, %8 in 1 : vector<64x17xbf16>, vector<64x256xbf16>, vector<64x17xbf16> -> vector<64x290xbf16>
    %10 = tpu.iota {dimensions = array<i32: 1>} : vector<1x256xi32>
    %c16_i32 = arith.constant 16 : i32
    %c0_i32_6 = arith.constant 0 : i32
    %11 = arith.cmpi eq, %c16_i32, %c0_i32_6 : i32
    %c1_i32 = arith.constant 1 : i32
    %12 = arith.select %11, %c1_i32, %c16_i32 : i32
    %13 = vector.broadcast %12 : i32 to vector<1x256xi32>
    %14 = arith.remsi %10, %13 : vector<1x256xi32>
    %c0_i32_7 = arith.constant 0 : i32
    %15 = vector.broadcast %c0_i32_7 : i32 to vector<1x256xi32>
    %16 = arith.cmpi ne, %14, %15 : vector<1x256xi32>
    %c0_i32_8 = arith.constant 0 : i32
    %17 = vector.broadcast %c0_i32_8 : i32 to vector<1x256xi32>
    %18 = arith.cmpi slt, %14, %17 : vector<1x256xi32>
    %c0_i32_9 = arith.constant 0 : i32
    %19 = arith.cmpi slt, %12, %c0_i32_9 : i32
    %20 = vector.broadcast %19 : i1 to vector<1x256xi1>
    %21 = vector.broadcast %20 : vector<1x256xi1> to vector<1x256xi1>
    %22 = arith.xori %18, %21 : vector<1x256xi1>
    %23 = arith.andi %22, %16 : vector<1x256xi1>
    %24 = vector.broadcast %12 : i32 to vector<1x256xi32>
    %25 = arith.addi %14, %24 : vector<1x256xi32>
    %26 = arith.select %23, %25, %14 : vector<1x256xi1>, vector<1x256xi32>
    %27 = vector.extract_strided_slice %9 {offsets = [0, 0], sizes = [64, 256], strides = [1, 1]} : vector<64x290xbf16> to vector<64x256xbf16>
    %c-1_i32 = arith.constant -1 : i32
    %28 = vector.broadcast %c-1_i32 : i32 to vector<1x256xi32>
    %29 = arith.addi %26, %28 : vector<1x256xi32>
    %c0_i32_10 = arith.constant 0 : i32
    %30 = vector.broadcast %c0_i32_10 : i32 to vector<1x256xi32>
    %31 = arith.cmpi sge, %29, %30 : vector<1x256xi32>
    %c-1_i32_11 = arith.constant -1 : i32
    %32 = vector.broadcast %c-1_i32_11 : i32 to vector<1x256xi32>
    %33 = arith.addi %26, %32 : vector<1x256xi32>
    %c16_i32_12 = arith.constant 16 : i32
    %34 = vector.broadcast %c16_i32_12 : i32 to vector<1x256xi32>
    %35 = arith.cmpi slt, %33, %34 : vector<1x256xi32>
    %36 = arith.andi %31, %35 : vector<1x256xi1>
    %cst_13 = arith.constant 1.000000e+00 : f32
    %cst_14 = arith.constant 0.000000e+00 : f32
    %37 = vector.broadcast %cst_13 : f32 to vector<1x256xf32>
    %38 = vector.broadcast %cst_14 : f32 to vector<1x256xf32>
    %39 = arith.select %36, %37, %38 : vector<1x256xi1>, vector<1x256xf32>
    %40 = arith.truncf %39 : vector<1x256xf32> to vector<1x256xbf16>
    %41 = vector.broadcast %40 : vector<1x256xbf16> to vector<64x256xbf16>
    %42 = arith.mulf %27, %41 : vector<64x256xbf16>
    %43 = vector.extract_strided_slice %9 {offsets = [0, 1], sizes = [64, 256], strides = [1, 1]} : vector<64x290xbf16> to vector<64x256xbf16>
    %44 = vector.extract_strided_slice %9 {offsets = [0, 2], sizes = [64, 256], strides = [1, 1]} : vector<64x290xbf16> to vector<64x256xbf16>
    %c1_i32_15 = arith.constant 1 : i32
    %45 = vector.broadcast %c1_i32_15 : i32 to vector<1x256xi32>
    %46 = arith.addi %26, %45 : vector<1x256xi32>
    %c0_i32_16 = arith.constant 0 : i32
    %47 = vector.broadcast %c0_i32_16 : i32 to vector<1x256xi32>
    %48 = arith.cmpi sge, %46, %47 : vector<1x256xi32>
    %c1_i32_17 = arith.constant 1 : i32
    %49 = vector.broadcast %c1_i32_17 : i32 to vector<1x256xi32>
    %50 = arith.addi %26, %49 : vector<1x256xi32>
    %c16_i32_18 = arith.constant 16 : i32
    %51 = vector.broadcast %c16_i32_18 : i32 to vector<1x256xi32>
    %52 = arith.cmpi slt, %50, %51 : vector<1x256xi32>
    %53 = arith.andi %48, %52 : vector<1x256xi1>
    %cst_19 = arith.constant 1.000000e+00 : f32
    %cst_20 = arith.constant 0.000000e+00 : f32
    %54 = vector.broadcast %cst_19 : f32 to vector<1x256xf32>
    %55 = vector.broadcast %cst_20 : f32 to vector<1x256xf32>
    %56 = arith.select %53, %54, %55 : vector<1x256xi1>, vector<1x256xf32>
    %57 = arith.truncf %56 : vector<1x256xf32> to vector<1x256xbf16>
    %58 = vector.broadcast %57 : vector<1x256xbf16> to vector<64x256xbf16>
    %59 = arith.mulf %44, %58 : vector<64x256xbf16>
    %60 = vector.extract_strided_slice %9 {offsets = [0, 16], sizes = [64, 256], strides = [1, 1]} : vector<64x290xbf16> to vector<64x256xbf16>
    %c-1_i32_21 = arith.constant -1 : i32
    %61 = vector.broadcast %c-1_i32_21 : i32 to vector<1x256xi32>
    %62 = arith.addi %26, %61 : vector<1x256xi32>
    %c0_i32_22 = arith.constant 0 : i32
    %63 = vector.broadcast %c0_i32_22 : i32 to vector<1x256xi32>
    %64 = arith.cmpi sge, %62, %63 : vector<1x256xi32>
    %c-1_i32_23 = arith.constant -1 : i32
    %65 = vector.broadcast %c-1_i32_23 : i32 to vector<1x256xi32>
    %66 = arith.addi %26, %65 : vector<1x256xi32>
    %c16_i32_24 = arith.constant 16 : i32
    %67 = vector.broadcast %c16_i32_24 : i32 to vector<1x256xi32>
    %68 = arith.cmpi slt, %66, %67 : vector<1x256xi32>
    %69 = arith.andi %64, %68 : vector<1x256xi1>
    %cst_25 = arith.constant 1.000000e+00 : f32
    %cst_26 = arith.constant 0.000000e+00 : f32
    %70 = vector.broadcast %cst_25 : f32 to vector<1x256xf32>
    %71 = vector.broadcast %cst_26 : f32 to vector<1x256xf32>
    %72 = arith.select %69, %70, %71 : vector<1x256xi1>, vector<1x256xf32>
    %73 = arith.truncf %72 : vector<1x256xf32> to vector<1x256xbf16>
    %74 = vector.broadcast %73 : vector<1x256xbf16> to vector<64x256xbf16>
    %75 = arith.mulf %60, %74 : vector<64x256xbf16>
    %76 = vector.extract_strided_slice %9 {offsets = [0, 17], sizes = [64, 256], strides = [1, 1]} : vector<64x290xbf16> to vector<64x256xbf16>
    %77 = vector.extract_strided_slice %9 {offsets = [0, 18], sizes = [64, 256], strides = [1, 1]} : vector<64x290xbf16> to vector<64x256xbf16>
    %c1_i32_27 = arith.constant 1 : i32
    %78 = vector.broadcast %c1_i32_27 : i32 to vector<1x256xi32>
    %79 = arith.addi %26, %78 : vector<1x256xi32>
    %c0_i32_28 = arith.constant 0 : i32
    %80 = vector.broadcast %c0_i32_28 : i32 to vector<1x256xi32>
    %81 = arith.cmpi sge, %79, %80 : vector<1x256xi32>
    %c1_i32_29 = arith.constant 1 : i32
    %82 = vector.broadcast %c1_i32_29 : i32 to vector<1x256xi32>
    %83 = arith.addi %26, %82 : vector<1x256xi32>
    %c16_i32_30 = arith.constant 16 : i32
    %84 = vector.broadcast %c16_i32_30 : i32 to vector<1x256xi32>
    %85 = arith.cmpi slt, %83, %84 : vector<1x256xi32>
    %86 = arith.andi %81, %85 : vector<1x256xi1>
    %cst_31 = arith.constant 1.000000e+00 : f32
    %cst_32 = arith.constant 0.000000e+00 : f32
    %87 = vector.broadcast %cst_31 : f32 to vector<1x256xf32>
    %88 = vector.broadcast %cst_32 : f32 to vector<1x256xf32>
    %89 = arith.select %86, %87, %88 : vector<1x256xi1>, vector<1x256xf32>
    %90 = arith.truncf %89 : vector<1x256xf32> to vector<1x256xbf16>
    %91 = vector.broadcast %90 : vector<1x256xbf16> to vector<64x256xbf16>
    %92 = arith.mulf %77, %91 : vector<64x256xbf16>
    %93 = vector.extract_strided_slice %9 {offsets = [0, 32], sizes = [64, 256], strides = [1, 1]} : vector<64x290xbf16> to vector<64x256xbf16>
    %c-1_i32_33 = arith.constant -1 : i32
    %94 = vector.broadcast %c-1_i32_33 : i32 to vector<1x256xi32>
    %95 = arith.addi %26, %94 : vector<1x256xi32>
    %c0_i32_34 = arith.constant 0 : i32
    %96 = vector.broadcast %c0_i32_34 : i32 to vector<1x256xi32>
    %97 = arith.cmpi sge, %95, %96 : vector<1x256xi32>
    %c-1_i32_35 = arith.constant -1 : i32
    %98 = vector.broadcast %c-1_i32_35 : i32 to vector<1x256xi32>
    %99 = arith.addi %26, %98 : vector<1x256xi32>
    %c16_i32_36 = arith.constant 16 : i32
    %100 = vector.broadcast %c16_i32_36 : i32 to vector<1x256xi32>
    %101 = arith.cmpi slt, %99, %100 : vector<1x256xi32>
    %102 = arith.andi %97, %101 : vector<1x256xi1>
    %cst_37 = arith.constant 1.000000e+00 : f32
    %cst_38 = arith.constant 0.000000e+00 : f32
    %103 = vector.broadcast %cst_37 : f32 to vector<1x256xf32>
    %104 = vector.broadcast %cst_38 : f32 to vector<1x256xf32>
    %105 = arith.select %102, %103, %104 : vector<1x256xi1>, vector<1x256xf32>
    %106 = arith.truncf %105 : vector<1x256xf32> to vector<1x256xbf16>
    %107 = vector.broadcast %106 : vector<1x256xbf16> to vector<64x256xbf16>
    %108 = arith.mulf %93, %107 : vector<64x256xbf16>
    %109 = vector.extract_strided_slice %9 {offsets = [0, 33], sizes = [64, 256], strides = [1, 1]} : vector<64x290xbf16> to vector<64x256xbf16>
    %110 = vector.extract_strided_slice %9 {offsets = [0, 34], sizes = [64, 256], strides = [1, 1]} : vector<64x290xbf16> to vector<64x256xbf16>
    %c1_i32_39 = arith.constant 1 : i32
    %111 = vector.broadcast %c1_i32_39 : i32 to vector<1x256xi32>
    %112 = arith.addi %26, %111 : vector<1x256xi32>
    %c0_i32_40 = arith.constant 0 : i32
    %113 = vector.broadcast %c0_i32_40 : i32 to vector<1x256xi32>
    %114 = arith.cmpi sge, %112, %113 : vector<1x256xi32>
    %c1_i32_41 = arith.constant 1 : i32
    %115 = vector.broadcast %c1_i32_41 : i32 to vector<1x256xi32>
    %116 = arith.addi %26, %115 : vector<1x256xi32>
    %c16_i32_42 = arith.constant 16 : i32
    %117 = vector.broadcast %c16_i32_42 : i32 to vector<1x256xi32>
    %118 = arith.cmpi slt, %116, %117 : vector<1x256xi32>
    %119 = arith.andi %114, %118 : vector<1x256xi1>
    %cst_43 = arith.constant 1.000000e+00 : f32
    %cst_44 = arith.constant 0.000000e+00 : f32
    %120 = vector.broadcast %cst_43 : f32 to vector<1x256xf32>
    %121 = vector.broadcast %cst_44 : f32 to vector<1x256xf32>
    %122 = arith.select %119, %120, %121 : vector<1x256xi1>, vector<1x256xf32>
    %123 = arith.truncf %122 : vector<1x256xf32> to vector<1x256xbf16>
    %124 = vector.broadcast %123 : vector<1x256xbf16> to vector<64x256xbf16>
    %125 = arith.mulf %110, %124 : vector<64x256xbf16>
    %126 = tpu.concatenate %42, %43, %59, %75, %76, %92, %108, %109, %125 in 0 : vector<64x256xbf16>, vector<64x256xbf16>, vector<64x256xbf16>, vector<64x256xbf16>, vector<64x256xbf16>, vector<64x256xbf16>, vector<64x256xbf16>, vector<64x256xbf16>, vector<64x256xbf16> -> vector<576x256xbf16>
    %c0_45 = arith.constant 0 : index
    %c0_46 = arith.constant 0 : index
    %127 = vector.load %arg3[%c0_45, %c0_46] : memref<64x576xbf16, #tpu.memory_space<vmem>>, vector<64x576xbf16>
    %cst_47 = arith.constant dense<0.000000e+00> : vector<64x256xf32>
    %128 = tpu.matmul %127, %126, %cst_47 {dimension_numbers = #tpu.dot_dimension_numbers<[1], [0], [0], [1], [0, 0, 1, 1], [], []>} : vector<64x576xbf16>, vector<576x256xbf16>, vector<64x256xf32> -> vector<64x256xf32>
    %c0_48 = arith.constant 0 : index
    %c0_49 = arith.constant 0 : index
    %129 = vector.load %arg4[%c0_48, %c0_49] : memref<64x1xf32, #tpu.memory_space<vmem>>, vector<64x1xf32>
    %130 = vector.broadcast %129 : vector<64x1xf32> to vector<64x256xf32>
    %131 = arith.addf %128, %130 : vector<64x256xf32>
    %132 = math.tanh %131 : vector<64x256xf32>
    %133 = vector.extract_strided_slice %132 {offsets = [0, 0], sizes = [32, 256], strides = [1, 1]} : vector<64x256xf32> to vector<32x256xf32>
    %cst_50 = arith.constant 5.000000e-01 : f32
    %134 = vector.broadcast %cst_50 : f32 to vector<32x256xf32>
    %135 = arith.mulf %134, %133 : vector<32x256xf32>
    %cst_51 = arith.constant 5.000000e-01 : f32
    %136 = vector.broadcast %cst_51 : f32 to vector<32x256xf32>
    %137 = arith.addf %135, %136 : vector<32x256xf32>
    %138 = vector.extract_strided_slice %132 {offsets = [32, 0], sizes = [32, 256], strides = [1, 1]} : vector<64x256xf32> to vector<32x256xf32>
    %139 = arith.subf %138, %5 : vector<32x256xf32>
    %140 = arith.mulf %137, %139 : vector<32x256xf32>
    %141 = arith.addf %5, %140 : vector<32x256xf32>
    %c0_52 = arith.constant 0 : index
    %c0_53 = arith.constant 0 : index
    %142 = vector.load %arg6[%c0_52, %c0_53] : memref<32x256xf32, #tpu.memory_space<vmem>>, vector<32x256xf32>
    tpu.vector_store %arg6[%c0_52, %c0_53], %141 {strides = array<i32>} : memref<32x256xf32, #tpu.memory_space<vmem>>, vector<32x256xf32>,
    %c0_54 = arith.constant 0 : index
    %c0_55 = arith.constant 0 : index
    %c0_56 = arith.constant 0 : index
    %c0_57 = arith.constant 0 : index
    %143 = vector.load %arg5[%c0_54, %c0_55, %c0_56, %c0_57] : memref<1x1x32x256xf32, #tpu.memory_space<vmem>>, vector<1x1x32x256xf32>
    %144 = vector.shape_cast %143 : vector<1x1x32x256xf32> to vector<32x256xf32>
    %145 = vector.shape_cast %141 : vector<32x256xf32> to vector<1x1x32x256xf32>
    tpu.vector_store %arg5[%c0_54, %c0_55, %c0_56, %c0_57], %145 {strides = array<i32>} : memref<1x1x32x256xf32, #tpu.memory_space<vmem>>, vector<1x1x32x256xf32>,
    return
  }
  func.func @transform_0(%arg0: i32, %arg1: i32) -> (i32, i32, i32, i32) {
    %c0_i32 = arith.constant 0 : i32
    %c0_i32_0 = arith.constant 0 : i32
    %c0_i32_1 = arith.constant 0 : i32
    return %arg0, %arg1, %c0_i32, %c0_i32_0 : i32, i32, i32, i32
  }
  func.func @transform_1(%arg0: i32, %arg1: i32) -> (i32, i32) {
    %c0_i32 = arith.constant 0 : i32
    %c0_i32_0 = arith.constant 0 : i32
    %c0_i32_1 = arith.constant 0 : i32
    return %c0_i32, %c0_i32_0 : i32, i32
  }
  func.func @transform_2(%arg0: i32, %arg1: i32) -> (i32, i32) {
    %c0_i32 = arith.constant 0 : i32
    %c0_i32_0 = arith.constant 0 : i32
    %c0_i32_1 = arith.constant 0 : i32
    return %c0_i32, %c0_i32_0 : i32, i32
  }
  func.func @transform_3(%arg0: i32, %arg1: i32) -> (i32, i32, i32, i32) {
    %c0_i32 = arith.constant 0 : i32
    %c0_i32_0 = arith.constant 0 : i32
    %c0_i32_1 = arith.constant 0 : i32
    return %arg0, %arg1, %c0_i32, %c0_i32_0 : i32, i32, i32, i32
  }
}

</mosaic_0001>

<bundles_post_ra>
// kernel: conv_sim_gru_forward.2
= control target key start
LH: loop header
LB: loop body
LE: loop exit
PB: predicated region body
PF: predicated region fallthrough
CT: control target
= control target key end

     0   :  { %s1472_s12 = smov 0   ;;  %s1474_s13 = smov 0   ;;  %s1914_s0 = inlined_call_operand.vmem [shape: bf16[2,8,16,256], index: 0, kind: input, shape index: {}]   ;;  %s1915_s1 = inlined_call_operand.vmem [shape: bf16[64,432], index: 1, kind: input, shape index: {}]   ;;  %s1916_s2 = inlined_call_operand.vmem [shape: f32[64,1], index: 2, kind: input, shape index: {}]   ;;  %s1917_s3 = inlined_call_operand.vmem [shape: f32[2,8,32,256], index: 3, kind: output, shape index: {}]  }
   0x1   :  { %s1476_s14 = smov 0   ;;  %s1478_s15 = smov 0  }
   0x2   :  { %s1480_s16 = smov 0  }
   0x3 LB: > { %s22_s17 = sadd.s32 1, %s1425_s14  ;;  %s25_s18 = sadd.s32 1, %s1429_s15  ;;  %s1433_s16 = sphi %s1480_s16, %s13_s16   ;;  %s1429_s15 = sphi %s1478_s15, %s1921_s15   ;;  %s1425_s14 = sphi %s1476_s14, %s1920_s14   ;;  %s1421_s13 = sphi %s1474_s13, %s1919_s13   ;;  %s1417_s12 = sphi %s1472_s12, %s1918_s12  }
   0x4   : > { %p23_p0 = scmp.ge.s32.totalorder %s22_s17, 8  ;;  %p1205_p1 = scmp.ge.s32.totalorder %s1433_s16, 1 }
   0x5   : > { %p157_p2 = scmp.lt.s32.totalorder %s1433_s16, 17 }
   0x6   : > { %s1923_s17 = smov (%p23_p0, %s22_s17), 0  ;;  %s1925_s18 = smov (!%p23_p0, %s25_s18), %s1429_s15 }
   0x7   : > { %p158_p3 = pnand %p1205_p1, %p157_p2  ;;  %p27_p4 = scmp.ge.s32.totalorder %s1925_s18, 2 }
   0x8   : > { %p189_p5 = scmp.lt.s32.totalorder (!%p158_p3), %s1421_s13, 1  ;;  %p191_p6 = scmp.lt.s32.totalorder (!%p158_p3), %s1417_s12, 7 }
   0x9   : > { %s1927_s18 = smov (%p27_p4, %s1925_s18), 0  ;;  %161 = sbr.rel (%p158_p3) target bundleno = 664 (0x298), region = 32 }
   0xa   : > { %p1212_p7 = scmp.ne.s32.totalorder (!%p158_p3), %s1417_s12, 0 }
  0x10   : > { %s1929_s13 = smov (!%p189_p5, %s1421_s13), 1  ;;  %211 = sbr.rel (%p1212_p7) target bundleno = 23 (0x17), region = 36 }
  0x11   : > { %s192_s19 = scalar_select %p191_p6, %s1417_s12, 7 }
  0x12   : > { %s1207_s20 = sshll.u32 %s1929_s13, 5  ;;  %s1210_s21 = sshll.u32 %s1929_s13, 6  ;;  %v1435_v0 = vmov (!%p1212_p7), 0.0  }
  0x13   : > { %s1206_s22 = sshll.u32 %s192_s19, 2  ;;  %s1209_s23 = sshll.u32 %s192_s19, 3  ;;  %212 = vst [vmem:[#allocation2] sm:$0xff] (!%p1212_p7), %v1435_v0  ;;  %213 = vst [vmem:[#allocation2 + $0x8] sm:$0xff] (!%p1212_p7), %v1435_v0 }
  0x14   : > { %s195_s24 = sadd.s32 %s1207_s20, %s1206_s22  ;;  %s204_s25 = sadd.s32 %s1210_s21, %s1209_s23  ;;  %214 = vst [vmem:[#allocation2 + $0x10] sm:$0xff] (!%p1212_p7), %v1435_v0  ;;  %215 = vst [vmem:[#allocation2 + $0x18] sm:$0xff] (!%p1212_p7), %v1435_v0 }
  0x15   : > { %s1208_s26 = sshll.u32 %s195_s24, 2  ;;  %s1211_s27 = sshll.u32 %s204_s25, 3  ;;  %216 = vst [vmem:[#allocation2 + $0x20] sm:$0xff] (!%p1212_p7), %v1435_v0  ;;  %217 = vst [vmem:[#allocation2 + $0x28] sm:$0xff] (!%p1212_p7), %v1435_v0 }
  0x16   : > { %s197_s30 = scalar_lea.vmem %s1914_s0, %s1208_s26  ;;  %s1512_s6 = scalar_lea.vmem %s1917_s3, %s1211_s27  ;;  %218 = vst [vmem:[#allocation2 + $0x30] sm:$0xff] (!%p1212_p7), %v1435_v0  ;;  %219 = vst [vmem:[#allocation2 + $0x38] sm:$0xff] (!%p1212_p7), %v1435_v0 }
  0x17 PF: > { %v285_v3 = vlaneseq  ;;  %v1328_v5 = vld [vmem:[%s197_s30] ss:$8 sps:$4 sm:$0xff]   ;;  %v1330_v6 = vld [vmem:[%s197_s30 + $0x4] ss:$8 sps:$4 sm:$0xff]   ;;  %s1436_s7 = smov 17   ;;  %v1437_v24 = vmov 0.0  }
  0x18   : > { %246 = vrot.lane.b32.xlu0 %v1328_v5, %s1436_s7  ;;  %s1438_s8 = smov 18   ;;  %s1439_s9 = smov 2   ;;  %vm258_vm4 = vcmask 138240   ;;  %vm348_vm5 = vcmask 15360   ;;  %vm386_vm6 = vcmask 146432   ;;  %vm404_vm7 = vcmask 261120  }
  0x19   : > { %v286_v10 = vand.u32 127, %v285_v3  ;;  %s1440_s10 = smov 32   ;;  %s1441_s11 = smov 16   ;;  %vm368_vm8 = vcmask 130048   ;;  %vm422_vm9 = vcmask 277504   ;;  %vm460_vm10 = vcmask 1039360  }
  0x1a   : > { %v222_v1 = vld [vmem:[#allocation2] sm:$0xff]  ;;  %v223_v7 = vld [vmem:[#allocation2 + $0x8] sm:$0xff]  ;;  %s1442_s12 = smov 34   ;;  %s1443_s13 = smov 127   ;;  %vm875_vm11 = vcmask 392192   ;;  %vm682_vm12 = vcmask 777216  }
  0x1b   : > { %v224_v2 = vld [vmem:[#allocation2 + $0x10] sm:$0xff]  ;;  %v225_v8 = vld [vmem:[#allocation2 + $0x18] sm:$0xff]  ;;  %v287_v15 = vadd.s32 128, %v286_v10  ;;  %v292_v16 = vand.u32 15, %v286_v10  ;;  %s1444_s19 = smov 95   ;;  %s1445_s20 = smov 111  }
  0x1c   : > { %v230_v4 = vpack.c.bf16 %v224_v2, %v222_v1  ;;  %v227_v9 = vld [vmem:[#allocation2 + $0x28] sm:$0xff]  ;;  %v231_v11 = vpack.c.bf16 %v225_v8, %v223_v7  ;;  %v226_v13 = vld [vmem:[#allocation2 + $0x20] sm:$0xff]  ;;  %248 = vrot.lane.b32.xlu0 %v1330_v6, %s1436_s7  ;;  %s1446_s21 = smov 126   ;;  %s1447_s22 = smov 110   ;;  %vm571_vm13 = vcmask 908288   ;;  %vm500_vm14 = vcmask 1031168  }
  0x1d   : > { %v229_v12 = vld [vmem:[#allocation2 + $0x38] sm:$0xff]  ;;  %v228_v14 = vld [vmem:[#allocation2 + $0x30] sm:$0xff]  ;;  %v299_v17 = vand.u32 15, %v287_v15  ;;  %v330_v18 = vadd.s32 1, %v292_v16  ;;  %v312_v23 = vadd.s32 4294967295, %v292_v16  ;;  %s1448_s23 = smov 96  }
  0x1e   : > { %250 = vrot.lane.b32.xlu1 %v230_v4, %s1436_s7  ;;  %v233_v19 = vpack.c.bf16 %v229_v12, %v227_v9  ;;  %v232_v20 = vpack.c.bf16 %v228_v14, %v226_v13  ;;  %s1449_s24 = smov 112   ;;  %s1450_s25 = smov 94   ;;  %vm611_vm15 = vcmask 900096  }
  0x1f   : > { %v331_v21 = vadd.s32 1, %v299_v17  ;;  %vm334_vm0 = vcmp.lt.s32.totalorder %v330_v18, 16  ;;  %v313_v22 = vadd.s32 4294967295, %v299_v17  ;;  %vm314_vm3 = vcmp.ge.s32.totalorder %v312_v23, 0 }
  0x20   : > { %v338_v25 = vsel %vm334_vm0, 1.0, %v1437_v24  ;;  %254 = vrot.lane.b32.xlu0 %v232_v20, %s1436_s7  ;;  %v320_v30 = vsel %vm314_vm3, 1.0, %v1437_v24  ;;  %vm540_vm0 = vcmask 916480  }
  0x21   : > { %vm335_vm1 = vcmp.lt.s32.totalorder %v331_v21, 16  ;;  %v340_v27 = vpack.c.bf16 %v338_v25, %v338_v25  ;;  %vm315_vm2 = vcmp.ge.s32.totalorder %v313_v22, 0  ;;  %v322_v32 = vpack.c.bf16 %v320_v30, %v320_v30 }
  0x22   : > { %252 = vrot.lane.b32.xlu1 %v231_v11, %s1436_s7  ;;  %v339_v26 = vsel %vm335_vm1, 1.0, %v1437_v24  ;;  %v321_v29 = vsel %vm315_vm2, 1.0, %v1437_v24  ;;  %vm651_vm1 = vcmask 785408   ;;  %vm722_vm2 = vcmask 769024  }
  0x23   : > { %v341_v28 = vpack.c.bf16 %v339_v26, %v339_v26  ;;  %v323_v31 = vpack.c.bf16 %v321_v29, %v321_v29 }
  0x24   : > { %382 = vrot.lane.b32.xlu0 %v340_v27, %s1438_s8 }
  0x26   : > { %256 = vrot.lane.b32.xlu1 %v233_v19, %s1436_s7 }
  0x28   : > { %344 = vrot.lane.b32.xlu0 %v340_v27, %s1439_s9 }
  0x2a   : > { %384 = vrot.lane.b32.xlu1 %v341_v28, %s1438_s8 }
  0x2c   : > { %400 = vrot.lane.b32.xlu0 %v322_v32, %s1440_s10 }
  0x2e   : > { %346 = vrot.lane.b32.xlu1 %v341_v28, %s1439_s9 }
  0x30   : > { %364 = vrot.lane.b32.xlu0 %v322_v32, %s1441_s11 }
  0x32   : > { %402 = vrot.lane.b32.xlu1 %v323_v31, %s1440_s10 }
  0x34   : > { %418 = vrot.lane.b32.xlu0 %v340_v27, %s1442_s12 }
  0x36   : > { %366 = vrot.lane.b32.xlu1 %v323_v31, %s1441_s11 }
  0x3a   : > { %420 = vrot.lane.b32.xlu1 %v341_v28, %s1442_s12 }
  0x8a   : > { %v247_v34 = vpop.permute.xlu0 %246 }
  0x8b   : > { %v1516_v35 = vsel %vm258_vm4, 0, %v247_v34 }
  0x8c   : > { %v324_v42 = vmul.bf16 %v322_v32, %v1516_v35 }
  0x8e   : > { %v249_v37 = vpop.permute.xlu0 %248 }
  0x8f   : > { %v1522_v39 = vsel %vm258_vm4, %v247_v34, %v249_v37  ;;  %v1525_v40 = vsel %vm258_vm4, %v249_v37, 0 }
  0x90   : > { %v251_v33 = vpop.permute.xlu1 %250  ;;  %446 = vrot.lane.b32.xlu1 %v1525_v40, %s1443_s13  ;;  %444 = vrot.lane.b32.xlu0 %v1522_v39, %s1443_s13  ;;  %v325_v41 = vmul.bf16 %v323_v31, %v1522_v39 }
  0x91   : > { %v1535_v44 = vsel %vm258_vm4, 0, %v251_v33 }
  0x92   : > { %888 = vmatprep.subr.bf16.mxu1 %v325_v41  ;;  %v255_v46 = vpop.permute.xlu0 %254  ;;  %v326_v49 = vmul.bf16 %v322_v32, %v1535_v44 }
  0x93   : > { %889 = vmatpush1.bf16.msra.mxu1 %v324_v42  ;;  %v1541_v48 = vsel %vm258_vm4, 0, %v255_v46 }
  0x94   : > { %v253_v36 = vpop.permute.xlu1 %252  ;;  %442 = vrot.lane.b32.xlu0 %v1516_v35, %s1443_s13  ;;  %v328_v54 = vmul.bf16 %v322_v32, %v1541_v48 }
  0x95   : > { %v1519_v38 = vsel %vm258_vm4, %v251_v33, %v253_v36  ;;  %v1554_v53 = vsel %vm258_vm4, %v253_v36, 0 }
  0x96   : > { %v327_v43 = vmul.bf16 %v323_v31, %v1519_v38  ;;  %450 = vrot.lane.b32.xlu1 %v1519_v38, %s1443_s13  ;;  %v1551_v52 = vpop.permute.xlu0 %382 }
  0x97   : > { %v391_v57 = vmul.bf16 %v1551_v52, %v1516_v35  ;;  %v394_v61 = vmul.bf16 %v1551_v52, %v1535_v44  ;;  %v397_v63 = vmul.bf16 %v1551_v52, %v1541_v48 }
  0x98   : > { %v257_v45 = vpop.permute.xlu1 %256  ;;  %890 = vmatprep.subr.bf16.mxu1 %v327_v43  ;;  %452 = vrot.lane.b32.xlu0 %v1554_v53, %s1443_s13 }
  0x99   : > { %v1538_v47 = vsel %vm258_vm4, %v255_v46, %v257_v45  ;;  %891 = vmatpush1.bf16.msra.mxu1 %v326_v49  ;;  %v1562_v55 = vsel %vm258_vm4, %v257_v45, 0 }
  0x9a   : > { %v329_v50 = vmul.bf16 %v323_v31, %v1538_v47  ;;  %448 = vrot.lane.b32.xlu1 %v1535_v44, %s1443_s13  ;;  %v345_v58 = vpop.permute.xlu0 %344 }
  0x9b   : > { %v353_v59 = vmul.bf16 %v345_v58, %v1516_v35  ;;  %v356_v62 = vmul.bf16 %v345_v58, %v1535_v44  ;;  %v359_v0 = vmul.bf16 %v345_v58, %v1541_v48 }
  0x9c   : > { %v1549_v51 = vpop.permute.xlu1 %384  ;;  %892 = vmatprep.subr.bf16.mxu1 %v329_v50  ;;  %456 = vrot.lane.b32.xlu0 %v1538_v47, %s1443_s13 }
  0x9d   : > { %v393_v56 = vmul.bf16 %v1549_v51, %v1525_v40  ;;  %893 = vmatpush1.bf16.msra.mxu1 %v328_v54  ;;  %v396_v10 = vmul.bf16 %v1549_v51, %v1554_v53  ;;  %v399_v13 = vmul.bf16 %v1549_v51, %v1562_v55  ;;  %v1649_v24 = vsel %vm386_vm6, %v1551_v52, %v1549_v51 }
  0x9e   : > { %458 = vrot.lane.b32.xlu1 %v1562_v55, %s1443_s13  ;;  %v1596_v60 = vpop.permute.xlu0 %400  ;;  %v395_v25 = vmul.bf16 %v1649_v24, %v1519_v38  ;;  %v398_v27 = vmul.bf16 %v1649_v24, %v1538_v47 }
  0x9f   : > { %v409_v2 = vmul.bf16 %v1596_v60, %v1516_v35  ;;  %v412_v4 = vmul.bf16 %v1596_v60, %v1535_v44  ;;  %v415_v6 = vmul.bf16 %v1596_v60, %v1541_v48 }
  0xa0   : > { %454 = vrot.lane.b32.xlu0 %v1541_v48, %s1443_s13  ;;  %v347_v8 = vpop.permute.xlu1 %346 }
  0xa1   : > { %v355_v9 = vmul.bf16 %v347_v8, %v1525_v40  ;;  %v358_v12 = vmul.bf16 %v347_v8, %v1554_v53  ;;  %v361_v14 = vmul.bf16 %v347_v8, %v1562_v55  ;;  %v349_v21 = vsel %vm348_vm5, %v345_v58, %v347_v8  ;;  %v1336_v8 = vld [vmem:[%s1915_s1 + $0xc] ss:$16 sps:$4 sm:$0xff]  }
  0xa2   : > { %666 = vrot.lane.b32.xlu1 %v1522_v39, %s1444_s19  ;;  %v365_v1 = vpop.permute.xlu0 %364  ;;  %v354_v23 = vmul.bf16 %v349_v21, %v1522_v39  ;;  %v357_v26 = vmul.bf16 %v349_v21, %v1519_v38  ;;  %v360_v28 = vmul.bf16 %v349_v21, %v1538_v47  ;;  %1231 = vmatprep.mubr.msk.bf16.mxu0 %vm875_vm11, %v1336_v8 }
  0xa3   : > { %v373_v3 = vmul.bf16 %v365_v1, %v1516_v35  ;;  %v376_v5 = vmul.bf16 %v365_v1, %v1535_v44  ;;  %v379_v7 = vmul.bf16 %v365_v1, %v1541_v48 }
  0xa4   : > { %668 = vrot.lane.b32.xlu0 %v1525_v40, %s1444_s19  ;;  %v403_v11 = vpop.permute.xlu1 %402 }
  0xa5   : > { %v411_v15 = vmul.bf16 %v403_v11, %v1525_v40  ;;  %v414_v18 = vmul.bf16 %v403_v11, %v1554_v53  ;;  %v417_v20 = vmul.bf16 %v403_v11, %v1562_v55  ;;  %v405_v29 = vsel %vm404_vm7, %v1596_v60, %v403_v11 }
  0xa6   : > { %664 = vrot.lane.b32.xlu1 %v1516_v35, %s1444_s19  ;;  %v410_v31 = vmul.bf16 %v405_v29, %v1522_v39  ;;  %v413_v33 = vmul.bf16 %v405_v29, %v1519_v38  ;;  %v416_v36 = vmul.bf16 %v405_v29, %v1538_v47  ;;  %v1678_v42 = vpop.permute.xlu0 %418 }
  0xa7   : > { %v427_v54 = vmul.bf16 %v1678_v42, %v1516_v35 }
  0xa8   : > { %674 = vrot.lane.b32.xlu0 %v1554_v53, %s1444_s19  ;;  %v367_v16 = vpop.permute.xlu1 %366 }
  0xa9   : > { %v375_v17 = vmul.bf16 %v367_v16, %v1525_v40  ;;  %v378_v19 = vmul.bf16 %v367_v16, %v1554_v53  ;;  %v381_v22 = vmul.bf16 %v367_v16, %v1562_v55  ;;  %v369_v30 = vsel %vm368_vm8, %v365_v1, %v367_v16 }
  0xaa   : > { %672 = vrot.lane.b32.xlu1 %v1519_v38, %s1444_s19  ;;  %v374_v32 = vmul.bf16 %v369_v30, %v1522_v39  ;;  %v377_v34 = vmul.bf16 %v369_v30, %v1519_v38  ;;  %v380_v37 = vmul.bf16 %v369_v30, %v1538_v47 }
  0xac   : > { %555 = vrot.lane.b32.xlu0 %v1522_v39, %s1445_s20  ;;  %v1676_v41 = vpop.permute.xlu1 %420 }
  0xad   : > { %v423_v43 = vsel %vm422_vm9, %v1678_v42, %v1676_v41  ;;  %v429_v50 = vmul.bf16 %v1676_v41, %v1525_v40 }
  0xae   : > { %670 = vrot.lane.b32.xlu1 %v1535_v44, %s1444_s19  ;;  %v428_v45 = vmul.bf16 %v423_v43, %v1522_v39 }
  0xb0   : > { %553 = vrot.lane.b32.xlu0 %v1516_v35, %s1445_s20 }
  0xb2   : > { %557 = vrot.lane.b32.xlu1 %v1525_v40, %s1445_s20 }
  0xb4   : > { %482 = vrot.lane.b32.xlu0 %v353_v59, %s1446_s21 }
  0xb6   : > { %678 = vrot.lane.b32.xlu1 %v1538_v47, %s1444_s19 }
  0xb8   : > { %488 = vrot.lane.b32.xlu0 %v356_v62, %s1446_s21 }
  0xba   : > { %599 = vrot.lane.b32.xlu1 %v394_v61, %s1447_s22 }
  0xbc   : > { %494 = vrot.lane.b32.xlu0 %v359_v0, %s1446_s21  ;;  %v431_v0 = vmul.bf16 %v423_v43, %v1519_v38 }
  0xbe   : > { %605 = vrot.lane.b32.xlu1 %v397_v63, %s1447_s22 }
  0xc0   : > { %522 = vrot.lane.b32.xlu0 %v373_v3, %s1449_s24  ;;  %v1333_v3 = vld [vmem:[%s1915_s1 + $0x4] ss:$16 sps:$4 sm:$0xff]  }
  0xc1   : > { %920 = vmatprep.mubr.bf16.mxu1 %v1333_v3 }
  0xc2   : > { %633 = vrot.lane.b32.xlu1 %v409_v2, %s1448_s23 }
  0xc4   : > { %528 = vrot.lane.b32.xlu0 %v376_v5, %s1449_s24 }
  0xc6   : > { %639 = vrot.lane.b32.xlu1 %v412_v4, %s1448_s23 }
  0xc8   : > { %534 = vrot.lane.b32.xlu0 %v379_v7, %s1449_s24 }
  0xca   : > { %645 = vrot.lane.b32.xlu1 %v415_v6, %s1448_s23  ;;  %v430_v6 = vmul.bf16 %v1678_v42, %v1535_v44 }
  0xcc   : > { %603 = vrot.lane.b32.xlu0 %v396_v10, %s1447_s22 }
  0xce   : > { %486 = vrot.lane.b32.xlu1 %v355_v9, %s1446_s21 }
  0xd0   : > { %609 = vrot.lane.b32.xlu0 %v399_v13, %s1447_s22  ;;  %v434_v13 = vmul.bf16 %v423_v43, %v1538_v47 }
  0xd2   : > { %492 = vrot.lane.b32.xlu1 %v358_v12, %s1446_s21 }
  0xd4   : > { %637 = vrot.lane.b32.xlu0 %v411_v15, %s1448_s23 }
  0xd6   : > { %498 = vrot.lane.b32.xlu1 %v361_v14, %s1446_s21 }
  0xd8   : > { %643 = vrot.lane.b32.xlu0 %v414_v18, %s1448_s23 }
  0xda   : > { %526 = vrot.lane.b32.xlu1 %v375_v17, %s1449_s24 }
  0xdc   : > { %649 = vrot.lane.b32.xlu0 %v417_v20, %s1448_s23 }
  0xde   : > { %532 = vrot.lane.b32.xlu1 %v378_v19, %s1449_s24 }
  0xe0   : > { %484 = vrot.lane.b32.xlu0 %v354_v23, %s1446_s21  ;;  %v752_v23 = vld [vmem:[%s1916_s2 + $0x8] sm:$0xff] }
  0xe2   : > { %538 = vrot.lane.b32.xlu1 %v381_v22, %s1449_s24  ;;  %v751_v22 = vld [vmem:[%s1916_s2] sm:$0xff] }
  0xe4   : > { %490 = vrot.lane.b32.xlu0 %v357_v26, %s1446_s21 }
  0xe6   : > { %601 = vrot.lane.b32.xlu1 %v395_v25, %s1447_s22 }
  0xe8   : > { %496 = vrot.lane.b32.xlu0 %v360_v28, %s1446_s21  ;;  %v753_v28 = vld [vmem:[%s1916_s2 + $0x10] sm:$0xff] }
  0xea   : > { %607 = vrot.lane.b32.xlu1 %v398_v27, %s1447_s22  ;;  %v754_v27 = vld [vmem:[%s1916_s2 + $0x18] sm:$0xff] }
  0xec   : > { %524 = vrot.lane.b32.xlu0 %v374_v32, %s1449_s24  ;;  %v755_v32 = vld [vmem:[%s1916_s2 + $0x20] sm:$0xff] }
  0xee   : > { %635 = vrot.lane.b32.xlu1 %v410_v31, %s1448_s23  ;;  %v756_v31 = vld [vmem:[%s1916_s2 + $0x28] sm:$0xff] }
  0xf0   : > { %530 = vrot.lane.b32.xlu0 %v377_v34, %s1449_s24 }
  0xf2   : > { %641 = vrot.lane.b32.xlu1 %v413_v33, %s1448_s23 }
  0xf4   : > { %536 = vrot.lane.b32.xlu0 %v380_v37, %s1449_s24  ;;  %v757_v37 = vld [vmem:[%s1916_s2 + $0x30] sm:$0xff] }
  0xf6   : > { %647 = vrot.lane.b32.xlu1 %v416_v36, %s1448_s23  ;;  %v758_v36 = vld [vmem:[%s1916_s2 + $0x38] sm:$0xff] }
  0xf8   : > { %680 = vrot.lane.b32.xlu0 %v1562_v55, %s1444_s19 }
  0xfa   : > { %676 = vrot.lane.b32.xlu1 %v1541_v48, %s1444_s19 }
  0xfc   : > { %561 = vrot.lane.b32.xlu0 %v1519_v38, %s1445_s20  ;;  %v432_v38 = vmul.bf16 %v1676_v41, %v1554_v53 }
  0xfe   : > { %563 = vrot.lane.b32.xlu1 %v1554_v53, %s1445_s20  ;;  %v392_v53 = vmul.bf16 %v1649_v24, %v1522_v39  ;;  %v1451_v24 = vmov 0  }
  0xff   : > { %1327 = vset.pattern.permute.xlu1 %v1451_v24  ;;  %1326 = vset.pattern.permute.xlu0 %v1451_v24 }
 0x100   : > { %559 = vrot.lane.b32.xlu0 %v1535_v44, %s1445_s20 }
 0x102   : > { %706 = vrot.lane.b32.xlu1 %v428_v45, %s1450_s25  ;;  %v447_v46 = vpop.permute.xlu1 %446  ;;  %v445_v49 = vpop.permute.xlu0 %444 }
 0x103   : > { %v462_v58 = vsel %vm460_vm10, %v445_v49, %v447_v46 }
 0x104   : > { %708 = vrot.lane.b32.xlu0 %v429_v50, %s1450_s25  ;;  %894 = vmatprep.subr.bf16.mxu1 %v462_v58 }
 0x106   : > { %704 = vrot.lane.b32.xlu1 %v427_v54, %s1450_s25  ;;  %v443_v60 = vpop.permute.xlu0 %442 }
 0x107   : > { %v461_v61 = vsel %vm460_vm10, %v443_v60, %v445_v49 }
 0x108   : > { %v451_v59 = vpop.permute.xlu1 %450  ;;  %567 = vrot.lane.b32.xlu0 %v1538_v47, %s1445_s20  ;;  %895 = vmatpush1.bf16.msra.mxu1 %v461_v61  ;;  %v433_v47 = vmul.bf16 %v1678_v42, %v1541_v48 }
 0x10a   : > { %569 = vrot.lane.b32.xlu1 %v1562_v55, %s1445_s20  ;;  %v453_v63 = vpop.permute.xlu0 %452 }
 0x10b   : > { %v464_v1 = vsel %vm460_vm10, %v451_v59, %v453_v63 }
 0x10c   : > { %v449_v62 = vpop.permute.xlu1 %448  ;;  %565 = vrot.lane.b32.xlu0 %v1541_v48, %s1445_s20  ;;  %896 = vmatprep.subr.bf16.mxu1 %v464_v1 }
 0x10d   : > { %v463_v2 = vsel %vm460_vm10, %v449_v62, %v451_v59 }
 0x10e   : > { %712 = vrot.lane.b32.xlu1 %v431_v0, %s1450_s25  ;;  %897 = vmatpush1.bf16.msra.mxu1 %v463_v2  ;;  %v457_v5 = vpop.permute.xlu0 %456 }
 0x110   : > { %v459_v4 = vpop.permute.xlu1 %458  ;;  %714 = vrot.lane.b32.xlu0 %v432_v38, %s1450_s25 }
 0x111   : > { %v466_v7 = vsel %vm460_vm10, %v457_v5, %v459_v4 }
 0x112   : > { %710 = vrot.lane.b32.xlu1 %v430_v6, %s1450_s25  ;;  %898 = vmatprep.subr.bf16.mxu1 %v466_v7  ;;  %v455_v10 = vpop.permute.xlu0 %454 }
 0x113   : > { %v465_v44 = vsel %vm460_vm10, %v455_v10, %v457_v5 }
 0x114   : > { %v667_v9 = vpop.permute.xlu1 %666  ;;  %595 = vrot.lane.b32.xlu0 %v392_v53, %s1447_s22  ;;  %899 = vmatpush1.bf16.msra.mxu1 %v465_v44 }
 0x116   : > { %597 = vrot.lane.b32.xlu1 %v393_v56, %s1447_s22  ;;  %v669_v12 = vpop.permute.xlu0 %668  ;;  %v435_v56 = vmul.bf16 %v1676_v41, %v1562_v55 }
 0x117   : > { %v1736_v14 = vsel %vm682_vm12, %v667_v9, %v669_v12 }
 0x118   : > { %v665_v11 = vpop.permute.xlu1 %664  ;;  %593 = vrot.lane.b32.xlu0 %v391_v57, %s1447_s22 }
 0x119   : > { %v1739_v39 = vsel %vm682_vm12, %v665_v11, %v667_v9 }
 0x11a   : > { %718 = vrot.lane.b32.xlu1 %v434_v13, %s1450_s25  ;;  %v675_v51 = vpop.permute.xlu0 %674 }
 0x11c   : > { %v673_v40 = vpop.permute.xlu1 %672  ;;  %720 = vrot.lane.b32.xlu0 %v435_v56, %s1450_s25 }
 0x11d   : > { %v1751_v15 = vsel %vm682_vm12, %v673_v40, %v675_v51 }
 0x11e   : > { %716 = vrot.lane.b32.xlu1 %v433_v47, %s1450_s25  ;;  %v556_v35 = vpop.permute.xlu0 %555 }
 0x120   : > { %v671_v16 = vpop.permute.xlu1 %670  ;;  %761 = vperm.xlu0 %1326, %v751_v22  }
 0x121   : > { %v1756_v52 = vsel %vm682_vm12, %v671_v16, %v673_v40 }
 0x122   : > { %v554_v17 = vpop.permute.xlu0 %553  ;;  %766 = vperm.xlu1 %1327, %v752_v23  }
 0x123   : > { %v1762_v48 = vsel %vm571_vm13, %v554_v17, %v556_v35 }
 0x124   : > { %v558_v57 = vpop.permute.xlu1 %557  ;;  %776 = vperm.xlu0 %1326, %v754_v27  }
 0x125   : > { %v1759_v55 = vsel %vm571_vm13, %v556_v35, %v558_v57 }
 0x126   : > { %v483_v19 = vpop.permute.xlu0 %482  ;;  %771 = vperm.xlu1 %1327, %v753_v28  }
 0x128   : > { %v1764_v18 = vpop.permute.xlu1 %678  ;;  %786 = vperm.xlu0 %1326, %v756_v31  }
 0x12a   : > { %v489_v21 = vpop.permute.xlu0 %488  ;;  %781 = vperm.xlu1 %1327, %v755_v32  }
 0x12c   : > { %v600_v20 = vpop.permute.xlu1 %599  ;;  %796 = vperm.xlu0 %1326, %v758_v36  }
 0x12e   : > { %v495_v26 = vpop.permute.xlu0 %494  ;;  %791 = vperm.xlu1 %1327, %v757_v37  }
 0x130   : > { %v606_v25 = vpop.permute.xlu1 %605 }
 0x132   : > { %v523_v30 = vpop.permute.xlu0 %522 }
 0x134   : > { %v634_v29 = vpop.permute.xlu1 %633 }
 0x136   : > { %v1786_v34 = vpop.permute.xlu0 %528 }
 0x138   : > { %v1784_v33 = vpop.permute.xlu1 %639 }
 0x13a   : > { %v1796_v42 = vpop.permute.xlu0 %534 }
 0x13c   : > { %v1794_v41 = vpop.permute.xlu1 %645 }
 0x13e   : > { %v604_v45 = vpop.permute.xlu0 %603 }
 0x140   : > { %v487_v43 = vpop.permute.xlu1 %486 }
 0x142   : > { %v610_v49 = vpop.permute.xlu0 %609 }
 0x144   : > { %v493_v46 = vpop.permute.xlu1 %492 }
 0x146   : > { %v638_v54 = vpop.permute.xlu0 %637 }
 0x148   : > { %v499_v50 = vpop.permute.xlu1 %498 }
 0x14a   : > { %v644_v59 = vpop.permute.xlu0 %643 }
 0x14c   : > { %v527_v58 = vpop.permute.xlu1 %526 }
 0x14e   : > { %v650_v61 = vpop.permute.xlu0 %649 }
 0x150   : > { %v533_v60 = vpop.permute.xlu1 %532 }
 0x152   : > { %v485_v63 = vpop.permute.xlu0 %484 }
 0x153   : > { %v502_v0 = vsel %vm500_vm14, %v485_v63, %v487_v43  ;;  %v501_v1 = vsel %vm500_vm14, %v483_v19, %v485_v63  ;;  %v1337_v63 = vld [vmem:[%s1915_s1 + $0x24] ss:$16 sps:$4 sm:$0xff]  }
 0x154   : > { %v539_v62 = vpop.permute.xlu1 %538  ;;  %900 = vmatprep.subr.bf16.mxu1 %v502_v0 }
 0x155   : > { %901 = vmatpush1.bf16.msra.mxu1 %v501_v1 }
 0x156   : > { %v491_v3 = vpop.permute.xlu0 %490 }
 0x157   : > { %v504_v4 = vsel %vm500_vm14, %v491_v3, %v493_v46  ;;  %v503_v38 = vsel %vm500_vm14, %v489_v21, %v491_v3 }
 0x158   : > { %v602_v2 = vpop.permute.xlu1 %601  ;;  %902 = vmatprep.subr.bf16.mxu1 %v504_v4  ;;  %v1334_v4 = vld [vmem:[%s1915_s1 + $0x8] ss:$16 sps:$4 sm:$0xff]  }
 0x159   : > { %v615_v5 = vsel %vm611_vm15, %v602_v2, %v604_v45  ;;  %v614_v6 = vsel %vm611_vm15, %v600_v20, %v602_v2  ;;  %903 = vmatpush1.bf16.msra.mxu1 %v503_v38  ;;  %v1339_v38 = vld [vmem:[%s1915_s1 + $0x20] ss:$16 sps:$4 sm:$0xff]  }
 0x15a   : > { %961 = vmatprep.subr.bf16.mxu0 %v615_v5  ;;  %v497_v8 = vpop.permute.xlu0 %496  ;;  %v1340_v5 = vld [vmem:[%s1915_s1 + $0x2c] ss:$16 sps:$4 sm:$0xff]  }
 0x15b   : > { %962 = vmatpush1.bf16.msra.mxu0 %v614_v6  ;;  %v506_v9 = vsel %vm500_vm14, %v497_v8, %v499_v50  ;;  %v505_v53 = vsel %vm500_vm14, %v495_v26, %v497_v8  ;;  %v1343_v6 = vld [vmem:[%s1915_s1 + $0x44] ss:$16 sps:$4 sm:$0xff]   ;;  %v1346_v8 = vld [vmem:[%s1915_s1 + $0x4c] ss:$16 sps:$4 sm:$0xff]  }
 0x15c   : > { %v608_v7 = vpop.permute.xlu1 %607  ;;  %904 = vmatprep.subr.bf16.mxu1 %v506_v9  ;;  %v1345_v9 = vld [vmem:[%s1915_s1 + $0x40] ss:$16 sps:$4 sm:$0xff]  }
 0x15d   : > { %v617_v10 = vsel %vm611_vm15, %v608_v7, %v610_v49  ;;  %v616_v44 = vsel %vm611_vm15, %v606_v25, %v608_v7  ;;  %905 = vmatpush1.bf16.msra.mxu1 %v505_v53  ;;  %v1342_v7 = vld [vmem:[%s1915_s1 + $0x28] ss:$16 sps:$4 sm:$0xff]  }
 0x15e   : > { %963 = vmatprep.subr.bf16.mxu0 %v617_v10  ;;  %v525_v12 = vpop.permute.xlu0 %524  ;;  %v1349_v10 = vld [vmem:[%s1915_s1 + $0x64] ss:$16 sps:$4 sm:$0xff]   ;;  %v1348_v53 = vld [vmem:[%s1915_s1 + $0x48] ss:$16 sps:$4 sm:$0xff]  }
 0x15f   : > { %964 = vmatpush1.bf16.msra.mxu0 %v616_v44  ;;  %v542_v13 = vsel %vm540_vm0, %v525_v12, %v527_v58  ;;  %v541_v51 = vsel %vm540_vm0, %v523_v30, %v525_v12  ;;  %v1352_v44 = vld [vmem:[%s1915_s1 + $0x6c] ss:$16 sps:$4 sm:$0xff]   ;;  %v1354_v12 = vld [vmem:[%s1915_s1 + $0x68] ss:$16 sps:$4 sm:$0xff]  }
 0x160   : > { %v636_v11 = vpop.permute.xlu1 %635  ;;  %906 = vmatprep.subr.bf16.mxu1 %v542_v13 }
 0x161   : > { %v653_v40 = vsel %vm651_vm1, %v636_v11, %v638_v54  ;;  %v652_v56 = vsel %vm651_vm1, %v634_v29, %v636_v11  ;;  %907 = vmatpush1.bf16.msra.mxu1 %v541_v51  ;;  %v1351_v11 = vld [vmem:[%s1915_s1 + $0x60] ss:$16 sps:$4 sm:$0xff]  }
 0x162   : > { %965 = vmatprep.subr.bf16.mxu0 %v653_v40  ;;  %v531_v16 = vpop.permute.xlu0 %530 }
 0x163   : > { %966 = vmatpush1.bf16.msra.mxu0 %v652_v56  ;;  %v544_v35 = vsel %vm540_vm0, %v531_v16, %v533_v60  ;;  %v543_v17 = vsel %vm540_vm0, %v1786_v34, %v531_v16 }
 0x164   : > { %v642_v47 = vpop.permute.xlu1 %641  ;;  %908 = vmatprep.subr.bf16.mxu1 %v544_v35 }
 0x165   : > { %v655_v57 = vsel %vm651_vm1, %v642_v47, %v644_v59  ;;  %v654_v19 = vsel %vm651_vm1, %v1784_v33, %v642_v47  ;;  %909 = vmatpush1.bf16.msra.mxu1 %v543_v17 }
 0x166   : > { %967 = vmatprep.subr.bf16.mxu0 %v655_v57  ;;  %v537_v21 = vpop.permute.xlu0 %536 }
 0x167   : > { %968 = vmatpush1.bf16.msra.mxu0 %v654_v19  ;;  %v546_v22 = vsel %vm540_vm0, %v537_v21, %v539_v62  ;;  %v545_v24 = vsel %vm540_vm0, %v1796_v42, %v537_v21  ;;  %v1331_v62 = vld [vmem:[%s1915_s1] ss:$16 sps:$4 sm:$0xff]  }
 0x168   : > { %v648_v20 = vpop.permute.xlu1 %647  ;;  %910 = vmatprep.subr.bf16.mxu1 %v546_v22 }
 0x169   : > { %v657_v23 = vsel %vm651_vm1, %v648_v20, %v650_v61  ;;  %v656_v25 = vsel %vm651_vm1, %v1794_v41, %v648_v20  ;;  %911 = vmatpush1.bf16.msra.mxu1 %v545_v24 }
 0x16a   : > { %969 = vmatprep.subr.bf16.mxu0 %v657_v23  ;;  %912 = vmatprep.subr.bf16.mxu1 %v1759_v55  ;;  %v681_v27 = vpop.permute.xlu0 %680 }
 0x16b   : > { %970 = vmatpush1.bf16.msra.mxu0 %v656_v25  ;;  %v688_v31 = vsel %vm682_vm12, %v1764_v18, %v681_v27 }
 0x16c   : > { %v677_v26 = vpop.permute.xlu1 %676  ;;  %971 = vmatprep.subr.bf16.mxu0 %v1736_v14 }
 0x16d   : > { %913 = vmatpush1.bf16.msra.mxu1 %v1762_v48 }
 0x16e   : > { %v562_v29 = vpop.permute.xlu0 %561 }
 0x16f   : > { %972 = vmatpush1.bf16.msra.mxu0 %v1739_v39  ;;  %v687_v39 = vsel %vm682_vm12, %v677_v26, %v1764_v18 }
 0x170   : > { %v564_v28 = vpop.permute.xlu1 %563  ;;  %973 = vmatprep.subr.bf16.mxu0 %v1751_v15 }
 0x171   : > { %v575_v30 = vsel %vm571_vm13, %v562_v29, %v564_v28 }
 0x172   : > { %914 = vmatprep.subr.bf16.mxu1 %v575_v30  ;;  %v560_v14 = vpop.permute.xlu0 %559 }
 0x173   : > { %974 = vmatpush1.bf16.msra.mxu0 %v1756_v52  ;;  %v574_v32 = vsel %vm571_vm13, %v560_v14, %v562_v29 }
 0x174   : > { %v707_v55 = vpop.permute.xlu1 %706  ;;  %975 = vmatprep.subr.bf16.mxu0 %v688_v31  ;;  %915 = vmatpush1.bf16.msra.mxu1 %v574_v32 }
 0x176   : > { %v709_v48 = vpop.permute.xlu0 %708 }
 0x177   : > { %976 = vmatpush1.bf16.msra.mxu0 %v687_v39  ;;  %v724_v33 = vsel %vm722_vm2, %v707_v55, %v709_v48 }
 0x178   : > { %v705_v15 = vpop.permute.xlu1 %704  ;;  %977 = vmatprep.subr.bf16.mxu0 %v724_v33 }
 0x179   : > { %v723_v52 = vsel %vm722_vm2, %v705_v15, %v707_v55 }
 0x17a   : > { %v568_v36 = vpop.permute.xlu0 %567 }
 0x17b   : > { %978 = vmatpush1.bf16.msra.mxu0 %v723_v52 }
 0x17c   : > { %v570_v34 = vpop.permute.xlu1 %569 }
 0x17d   : > { %v577_v37 = vsel %vm571_vm13, %v568_v36, %v570_v34 }
 0x17e   : > { %916 = vmatprep.subr.bf16.mxu1 %v577_v37  ;;  %v566_v42 = vpop.permute.xlu0 %565 }
 0x17f   : > { %v576_v43 = vsel %vm571_vm13, %v566_v42, %v568_v36 }
 0x180   : > { %v713_v41 = vpop.permute.xlu1 %712  ;;  %917 = vmatpush1.bf16.msra.mxu1 %v576_v43 }
 0x182   : > { %v715_v45 = vpop.permute.xlu0 %714 }
 0x183   : > { %v726_v46 = vsel %vm722_vm2, %v713_v41, %v715_v45 }
 0x184   : > { %v711_v18 = vpop.permute.xlu1 %710  ;;  %979 = vmatprep.subr.bf16.mxu0 %v726_v46 }
 0x185   : > { %v725_v49 = vsel %vm722_vm2, %v711_v18, %v713_v41 }
 0x186   : > { %980 = vmatpush1.bf16.msra.mxu0 %v725_v49  ;;  %v596_v54 = vpop.permute.xlu0 %595 }
 0x188   : > { %v598_v50 = vpop.permute.xlu1 %597 }
 0x189   : > { %v613_v58 = vsel %vm611_vm15, %v596_v54, %v598_v50 }
 0x18a   : > { %918 = vmatprep.subr.bf16.mxu1 %v613_v58  ;;  %v594_v60 = vpop.permute.xlu0 %593 }
 0x18b   : > { %v612_v61 = vsel %vm611_vm15, %v594_v60, %v596_v54 }
 0x18c   : > { %v719_v59 = vpop.permute.xlu1 %718  ;;  %919 = vmatpush1.bf16.msra.mxu1 %v612_v61 }
 0x18e   : > { %v721_v1 = vpop.permute.xlu0 %720 }
 0x18f   : > { %921 = vmatmul.mubr.bf16.vlgmr.msra.gmra.mrb[0].mxu1 %v1331_v62  ;;  %v728_v2 = vsel %vm722_vm2, %v719_v59, %v721_v1 }
 0x190   : > { %v717_v0 = vpop.permute.xlu1 %716  ;;  %981 = vmatprep.subr.bf16.mxu0 %v728_v2  ;;  %930 = vmatprep.mubr.bf16.mxu1 %v1337_v63 }
 0x191   : > { %v727_v3 = vsel %vm722_vm2, %v717_v0, %v719_v59 }
 0x192   : > { %982 = vmatpush1.bf16.msra.mxu0 %v727_v3 }
 0x195   : > { %994 = vmatmul.mubr.bf16.vlgmr.msra.gmra.mrb[0].mxu0 %v1334_v4 }
 0x196   : > { %1232 = vmatprep.mubr.msk.bf16.mxu0 %vm875_vm11, %v1340_v5 }
 0x197   : > { %931 = vmatmul.mubr.bf16.gmra.mrb[4].mxu1 %v1339_v38 }
 0x198   : > { %940 = vmatprep.mubr.bf16.mxu1 %v1343_v6 }
 0x19d   : > { %1004 = vmatmul.mubr.bf16.gmra.mrb[4].mxu0 %v1342_v7 }
 0x19e   : > { %1233 = vmatprep.mubr.msk.bf16.mxu0 %vm875_vm11, %v1346_v8 }
 0x19f   : > { %941 = vmatmul.mubr.bf16.gmra.mrb[8].mxu1 %v1345_v9  ;;  %v762_v13 = vpop.permute.xlu0 %761 }
 0x1a0   : > { %950 = vmatprep.mubr.bf16.mxu1 %v1349_v10 }
 0x1a1   : > { %v767_v16 = vpop.permute.xlu1 %766 }
 0x1a3   : > { %v777_v32 = vpop.permute.xlu0 %776 }
 0x1a5   : > { %1014 = vmatmul.mubr.bf16.gmra.mrb[8].mxu0 %v1348_v53  ;;  %v772_v25 = vpop.permute.xlu1 %771 }
 0x1a6   : > { %1234 = vmatprep.mubr.msk.bf16.mxu0 %vm875_vm11, %v1352_v44 }
 0x1a7   : > { %951 = vmatmul.mubr.bf16.gmra.mrb[12].mxu1 %v1351_v11  ;;  %v787_v58 = vpop.permute.xlu0 %786 }
 0x1a9   : > { %v782_v18 = vpop.permute.xlu1 %781 }
 0x1ab   : > { %v797_v11 = vpop.permute.xlu0 %796 }
 0x1ad   : > { %1024 = vmatmul.mubr.bf16.gmra.mrb[12].mxu0 %v1354_v12  ;;  %v792_v8 = vpop.permute.xlu1 %791 }
 0x262   : > { %v922_v40 = vpop.f32.mrb[0].mxu1 }
 0x263   : > { %v924_v51 = vpop.f32.mrb[1].mxu1  ;;  %v923_v47 = vadd.f32 %v922_v40, %v762_v13 }
 0x264   : > { %v926_v56 = vpop.f32.mrb[2].mxu1  ;;  %v925_v57 = vadd.f32 %v924_v51, %v762_v13 }
 0x265   : > { %v928_v35 = vpop.f32.mrb[3].mxu1  ;;  %v927_v19 = vadd.f32 %v926_v56, %v767_v16 }
 0x266   : > { %v929_v22 = vadd.f32 %v928_v35, %v767_v16 }
 0x268   : > { %v995_v17 = vpop.f32.mrb[0].mxu0 }
 0x269   : > { %v996_v20 = vadd.f32 %v995_v17, %v923_v47  ;;  %v997_v21 = vpop.f32.mrb[1].mxu0 }
 0x26a   : > { %v998_v23 = vadd.f32 %v997_v21, %v925_v57  ;;  %v999_v24 = vpop.f32.mrb[2].mxu0  ;;  %v932_v27 = vpop.f32.mrb[4].mxu1 }
 0x26b   : > { %v1000_v26 = vadd.f32 %v999_v24, %v927_v19  ;;  %v1001_v28 = vpop.f32.mrb[3].mxu0  ;;  %v934_v30 = vpop.f32.mrb[5].mxu1  ;;  %v933_v31 = vadd.f32 %v932_v27, %v772_v25  ;;  %1355 = vtanh.f32 %v996_v20 }
 0x26c   : > { %v1002_v29 = vadd.f32 %v1001_v28, %v929_v22  ;;  %v936_v55 = vpop.f32.mrb[6].mxu1  ;;  %v935_v14 = vadd.f32 %v934_v30, %v772_v25  ;;  %1357 = vtanh.f32 %v998_v23 }
 0x26d   : > { %v938_v39 = vpop.f32.mrb[7].mxu1  ;;  %v937_v48 = vadd.f32 %v936_v55, %v777_v32  ;;  %1359 = vtanh.f32 %v1000_v26 }
 0x26e   : > { %v939_v34 = vadd.f32 %v938_v39, %v777_v32  ;;  %1361 = vtanh.f32 %v1002_v29  ;;  %v1388_v39 = vld [vmem:[#allocation2 + $0x8] sm:$0xff] }
 0x270   : > { %v1005_v15 = vpop.f32.mrb[4].mxu0 }
 0x271   : > { %v1006_v33 = vadd.f32 %v1005_v15, %v933_v31  ;;  %v1007_v52 = vpop.f32.mrb[5].mxu0  ;;  %v1387_v31 = vld [vmem:[#allocation2] sm:$0xff] }
 0x272   : > { %v1008_v36 = vadd.f32 %v1007_v52, %v935_v14  ;;  %v1009_v37 = vpop.f32.mrb[6].mxu0  ;;  %v942_v42 = vpop.f32.mrb[8].mxu1 }
 0x273   : > { %v1010_v41 = vadd.f32 %v1009_v37, %v937_v48  ;;  %v1011_v43 = vpop.f32.mrb[7].mxu0  ;;  %v944_v46 = vpop.f32.mrb[9].mxu1  ;;  %v943_v49 = vadd.f32 %v942_v42, %v782_v18  ;;  %1363 = vtanh.f32 %v1006_v33 }
 0x274   : > { %v1012_v45 = vadd.f32 %v1011_v43, %v939_v34  ;;  %v946_v50 = vpop.f32.mrb[10].mxu1  ;;  %v945_v59 = vadd.f32 %v944_v46, %v782_v18  ;;  %1365 = vtanh.f32 %v1008_v36  ;;  %v1389_v34 = vld [vmem:[#allocation2 + $0x10] sm:$0xff]  ;;  %v1390_v43 = vld [vmem:[#allocation2 + $0x18] sm:$0xff] }
 0x275   : > { %v948_v54 = vpop.f32.mrb[11].mxu1  ;;  %v947_v61 = vadd.f32 %v946_v50, %v787_v58  ;;  %v1356_v10 = vpop.eup %1355 }
 0x276   : > { %v949_v0 = vadd.f32 %v948_v54, %v787_v58  ;;  %v1358_v44 = vpop.eup %1357  ;;  %v1050_v35 = vmul.f32 0.5, %v1356_v10 }
 0x277   : > { %v1360_v40 = vpop.eup %1359  ;;  %v1051_v21 = vmul.f32 0.5, %v1358_v44 }
 0x278   : > { %v1015_v60 = vpop.f32.mrb[8].mxu0  ;;  %v1362_v16 = vpop.eup %1361  ;;  %v1052_v25 = vmul.f32 0.5, %v1360_v40  ;;  %v1058_v30 = vadd.f32 0.5, %v1050_v35 }
 0x279   : > { %v1016_v62 = vadd.f32 %v1015_v60, %v943_v49  ;;  %v1017_v63 = vpop.f32.mrb[9].mxu0  ;;  %v1053_v28 = vmul.f32 0.5, %v1362_v16  ;;  %v1059_v32 = vadd.f32 0.5, %v1051_v21 }
 0x27a   : > { %v1018_v1 = vadd.f32 %v1017_v63, %v945_v59  ;;  %v1019_v2 = vpop.f32.mrb[10].mxu0  ;;  %v952_v4 = vpop.f32.mrb[12].mxu1  ;;  %v1060_v33 = vadd.f32 0.5, %v1052_v25 }
 0x27b   : > { %1367 = vtanh.f32 %v1016_v62  ;;  %v1020_v3 = vadd.f32 %v1019_v2, %v947_v61  ;;  %v1021_v5 = vpop.f32.mrb[11].mxu0  ;;  %v954_v6 = vpop.f32.mrb[13].mxu1  ;;  %v953_v53 = vadd.f32 %v952_v4, %v792_v8 }
 0x27c   : > { %1369 = vtanh.f32 %v1018_v1  ;;  %v1022_v38 = vadd.f32 %v1021_v5, %v949_v0  ;;  %v956_v7 = vpop.f32.mrb[14].mxu1  ;;  %v955_v12 = vadd.f32 %v954_v6, %v792_v8  ;;  %v1392_v6 = vld [vmem:[#allocation2 + $0x28] sm:$0xff] }
 0x27d   : > { %1371 = vtanh.f32 %v1020_v3  ;;  %v958_v9 = vpop.f32.mrb[15].mxu1  ;;  %v957_v51 = vadd.f32 %v956_v7, %v797_v11  ;;  %v1364_v20 = vpop.eup %1363  ;;  %v1391_v3 = vld [vmem:[#allocation2 + $0x20] sm:$0xff] }
 0x27e   : > { %1373 = vtanh.f32 %v1022_v38  ;;  %v959_v57 = vadd.f32 %v958_v9, %v797_v11  ;;  %v1366_v24 = vpop.eup %1365  ;;  %v1054_v46 = vmul.f32 0.5, %v1364_v20 }
 0x27f   : > { %1375 = vtanh.f32 %v1010_v41  ;;  %v1061_v41 = vadd.f32 0.5, %v1053_v28  ;;  %v1055_v54 = vmul.f32 0.5, %v1366_v24 }
 0x280   : > { %1377 = vtanh.f32 %v1012_v45  ;;  %v1025_v13 = vpop.f32.mrb[12].mxu0  ;;  %v1062_v2 = vadd.f32 0.5, %v1054_v46 }
 0x281   : > { %v1026_v56 = vadd.f32 %v1025_v13, %v953_v53  ;;  %v1027_v47 = vpop.f32.mrb[13].mxu0  ;;  %v1063_v38 = vadd.f32 0.5, %v1055_v54  ;;  %v1393_v53 = vld [vmem:[#allocation2 + $0x30] sm:$0xff]  ;;  %v1394_v13 = vld [vmem:[#allocation2 + $0x38] sm:$0xff] }
 0x282   : > { %v1028_v17 = vadd.f32 %v1027_v47, %v955_v12  ;;  %v1029_v19 = vpop.f32.mrb[14].mxu0 }
 0x283   : > { %1379 = vtanh.f32 %v1026_v56  ;;  %v1030_v22 = vadd.f32 %v1029_v19, %v957_v51  ;;  %v1031_v23 = vpop.f32.mrb[15].mxu0 }
 0x284   : > { %1381 = vtanh.f32 %v1028_v17  ;;  %v1032_v26 = vadd.f32 %v1031_v23, %v959_v57 }
 0x285   : > { %v1368_v27 = vpop.eup %1367  ;;  %1383 = vtanh.f32 %v1030_v22 }
 0x286   : > { %v1370_v29 = vpop.eup %1369  ;;  %v1066_v55 = vsub.f32 %v1368_v27, %v1387_v31  ;;  %1385 = vtanh.f32 %v1032_v26 }
 0x287   : > { %v1372_v14 = vpop.eup %1371  ;;  %v1067_v15 = vsub.f32 %v1370_v29, %v1388_v39 }
 0x288   : > { %v1374_v48 = vpop.eup %1373  ;;  %v1074_v52 = vmul.f32 %v1066_v55, %v1058_v30  ;;  %v1068_v36 = vsub.f32 %v1372_v14, %v1389_v34 }
 0x289   : > { %v1376_v37 = vpop.eup %1375  ;;  %v1075_v42 = vmul.f32 %v1067_v15, %v1059_v32  ;;  %v1069_v18 = vsub.f32 %v1374_v48, %v1390_v43 }
 0x28a   : > { %v1378_v45 = vpop.eup %1377  ;;  %v1082_v49 = vadd.f32 %v1387_v31, %v1074_v52  ;;  %v1076_v50 = vmul.f32 %v1068_v36, %v1060_v33  ;;  %v1056_v60 = vmul.f32 0.5, %v1376_v37 }
 0x28b   : > { %v1083_v58 = vadd.f32 %v1388_v39, %v1075_v42  ;;  %v1077_v59 = vmul.f32 %v1069_v18, %v1061_v41  ;;  %v1057_v63 = vmul.f32 0.5, %v1378_v45 }
 0x28c   : > { %1090 = vst [vmem:[#allocation2] sm:$0xff] %v1082_v49  ;;  %1098 = vst [vmem:[%s1512_s6] sm:$0xff] %v1082_v49  ;;  %v1084_v61 = vadd.f32 %v1389_v34, %v1076_v50  ;;  %v1064_v9 = vadd.f32 0.5, %v1056_v60 }
 0x28d   : > { %v1380_v62 = vpop.eup %1379  ;;  %1091 = vst [vmem:[#allocation2 + $0x8] sm:$0xff] %v1083_v58  ;;  %1099 = vst [vmem:[%s1512_s6 + $0x8] sm:$0xff] %v1083_v58  ;;  %v1085_v0 = vadd.f32 %v1390_v43, %v1077_v59  ;;  %v1065_v11 = vadd.f32 0.5, %v1057_v63 }
 0x28e   : > { %v1382_v1 = vpop.eup %1381  ;;  %1092 = vst [vmem:[#allocation2 + $0x10] sm:$0xff] %v1084_v61  ;;  %1100 = vst [vmem:[%s1512_s6 + $0x10] sm:$0xff] %v1084_v61  ;;  %v1070_v4 = vsub.f32 %v1380_v62, %v1391_v3 }
 0x28f   : > { %v1384_v5 = vpop.eup %1383  ;;  %1093 = vst [vmem:[#allocation2 + $0x18] sm:$0xff] %v1085_v0  ;;  %1101 = vst [vmem:[%s1512_s6 + $0x18] sm:$0xff] %v1085_v0  ;;  %v1071_v7 = vsub.f32 %v1382_v1, %v1392_v6 }
 0x290   : > { %v1386_v8 = vpop.eup %1385  ;;  %v1078_v10 = vmul.f32 %v1070_v4, %v1062_v2  ;;  %v1072_v44 = vsub.f32 %v1384_v5, %v1393_v53 }
 0x291   : > { %v1079_v12 = vmul.f32 %v1071_v7, %v1063_v38  ;;  %v1073_v40 = vsub.f32 %v1386_v8, %v1394_v13 }
 0x292   : > { %v1086_v51 = vadd.f32 %v1391_v3, %v1078_v10  ;;  %v1080_v56 = vmul.f32 %v1072_v44, %v1064_v9 }
 0x293   : > { %v1087_v47 = vadd.f32 %v1392_v6, %v1079_v12  ;;  %v1081_v16 = vmul.f32 %v1073_v40, %v1065_v11 }
 0x294   : > { %1094 = vst [vmem:[#allocation2 + $0x20] sm:$0xff] %v1086_v51  ;;  %1102 = vst [vmem:[%s1512_s6 + $0x20] sm:$0xff] %v1086_v51  ;;  %v1088_v35 = vadd.f32 %v1393_v53, %v1080_v56 }
 0x295   : > { %1095 = vst [vmem:[#allocation2 + $0x28] sm:$0xff] %v1087_v47  ;;  %1103 = vst [vmem:[%s1512_s6 + $0x28] sm:$0xff] %v1087_v47  ;;  %v1089_v57 = vadd.f32 %v1394_v13, %v1081_v16 }
 0x296   : > { %1096 = vst [vmem:[#allocation2 + $0x30] sm:$0xff] %v1088_v35  ;;  %1104 = vst [vmem:[%s1512_s6 + $0x30] sm:$0xff] %v1088_v35 }
 0x297   : > { %1097 = vst [vmem:[#allocation2 + $0x38] sm:$0xff] %v1089_v57  ;;  %1105 = vst [vmem:[%s1512_s6 + $0x38] sm:$0xff] %v1089_v57 }
 0x298 PF: > { %s13_s16 = sadd.s32 1, %s1433_s16   ;;  %s1918_s12 = smov %s1425_s14 }
 0x299   : > { %p10_p8 = scmp.ge.s32.totalorder %s13_s16, 18   ;;  %s1919_s13 = smov %s1429_s15 }
 0x29a   : > { %s1920_s14 = smov %s1923_s17  ;;  %s1921_s15 = smov %s1927_s18 }
 0x29b   :  { %12 = sbr.rel (!%p10_p8) target bundleno = 3 (0x3), region = 66 }

// kernel: conv_sim_gru_forward.3
= control target key start
LH: loop header
LB: loop body
LE: loop exit
PB: predicated region body
PF: predicated region fallthrough
CT: control target
= control target key end

     0   :  { %s1750_s12 = smov 0   ;;  %s1752_s13 = smov 0   ;;  %s2302_s0 = inlined_call_operand.vmem [shape: bf16[2,8,32,256], index: 0, kind: input, shape index: {}]   ;;  %s2303_s1 = inlined_call_operand.vmem [shape: bf16[64,576], index: 1, kind: input, shape index: {}]   ;;  %s2304_s2 = inlined_call_operand.vmem [shape: f32[64,1], index: 2, kind: input, shape index: {}]   ;;  %s2305_s3 = inlined_call_operand.vmem [shape: f32[2,8,32,256], index: 3, kind: output, shape index: {}]  }
   0x1   :  { %s1754_s14 = smov 0   ;;  %s1756_s15 = smov 0  }
   0x2   :  { %s1758_s16 = smov 0  }
   0x3 LB: > { %s22_s17 = sadd.s32 1, %s1703_s14  ;;  %s25_s18 = sadd.s32 1, %s1707_s15  ;;  %s1711_s16 = sphi %s1758_s16, %s13_s16   ;;  %s1707_s15 = sphi %s1756_s15, %s2309_s15   ;;  %s1703_s14 = sphi %s1754_s14, %s2308_s14   ;;  %s1699_s13 = sphi %s1752_s13, %s2307_s13   ;;  %s1695_s12 = sphi %s1750_s12, %s2306_s12  }
   0x4   : > { %p23_p0 = scmp.ge.s32.totalorder %s22_s17, 8  ;;  %p1446_p1 = scmp.ge.s32.totalorder %s1711_s16, 1 }
   0x5   : > { %p157_p2 = scmp.lt.s32.totalorder %s1711_s16, 17 }
   0x6   : > { %s2311_s17 = smov (%p23_p0, %s22_s17), 0  ;;  %s2313_s18 = smov (!%p23_p0, %s25_s18), %s1707_s15 }
   0x7   : > { %p158_p3 = pnand %p1446_p1, %p157_p2  ;;  %p27_p4 = scmp.ge.s32.totalorder %s2313_s18, 2 }
   0x8   : > { %p189_p5 = scmp.lt.s32.totalorder (!%p158_p3), %s1699_s13, 1  ;;  %p191_p6 = scmp.lt.s32.totalorder (!%p158_p3), %s1695_s12, 7 }
   0x9   : > { %s2315_s18 = smov (%p27_p4, %s2313_s18), 0  ;;  %161 = sbr.rel (%p158_p3) target bundleno = 704 (0x2c0), region = 32 }
   0xa   : > { %p1453_p7 = scmp.ne.s32.totalorder (!%p158_p3), %s1695_s12, 0 }
  0x10   : > { %s2317_s13 = smov (!%p189_p5, %s1699_s13), 1  ;;  %211 = sbr.rel (%p1453_p7) target bundleno = 23 (0x17), region = 36 }
  0x11   : > { %s192_s19 = scalar_select %p191_p6, %s1695_s12, 7 }
  0x12   : > { %s1448_s20 = sshll.u32 %s2317_s13, 6  ;;  %v1713_v0 = vmov (!%p1453_p7), 0.0  }
  0x13   : > { %s1447_s21 = sshll.u32 %s192_s19, 3  ;;  %212 = vst [vmem:[#allocation2] sm:$0xff] (!%p1453_p7), %v1713_v0  ;;  %213 = vst [vmem:[#allocation2 + $0x8] sm:$0xff] (!%p1453_p7), %v1713_v0 }
  0x14   : > { %s195_s22 = sadd.s32 %s1448_s20, %s1447_s21  ;;  %214 = vst [vmem:[#allocation2 + $0x10] sm:$0xff] (!%p1453_p7), %v1713_v0  ;;  %215 = vst [vmem:[#allocation2 + $0x18] sm:$0xff] (!%p1453_p7), %v1713_v0 }
  0x15   : > { %s1449_s23 = sshll.u32 %s195_s22, 2  ;;  %s1452_s24 = sshll.u32 %s195_s22, 3  ;;  %216 = vst [vmem:[#allocation2 + $0x20] sm:$0xff] (!%p1453_p7), %v1713_v0  ;;  %217 = vst [vmem:[#allocation2 + $0x28] sm:$0xff] (!%p1453_p7), %v1713_v0 }
  0x16   : > { %s197_s27 = scalar_lea.vmem %s2302_s0, %s1449_s23  ;;  %s1786_s30 = scalar_lea.vmem %s2305_s3, %s1452_s24  ;;  %218 = vst [vmem:[#allocation2 + $0x30] sm:$0xff] (!%p1453_p7), %v1713_v0  ;;  %219 = vst [vmem:[#allocation2 + $0x38] sm:$0xff] (!%p1453_p7), %v1713_v0 }
  0x17 PF: > { %v1599_v1 = vld [vmem:[%s197_s27 + $0x10] ss:$8 sps:$4 sm:$0xff]   ;;  %v307_v2 = vlaneseq  ;;  %v1601_v3 = vld [vmem:[%s197_s27 + $0x14] ss:$8 sps:$4 sm:$0xff]   ;;  %s1714_s4 = smov 17   ;;  %v1715_v25 = vmov 0.0  }
  0x18   : > { %260 = vrot.lane.b32.xlu1 %v1599_v1, %s1714_s4  ;;  %v1602_v4 = vld [vmem:[%s197_s27] ss:$8 sps:$4 sm:$0xff]   ;;  %v1604_v8 = vld [vmem:[%s197_s27 + $0x4] ss:$8 sps:$4 sm:$0xff]   ;;  %s1716_s5 = smov 18   ;;  %s1717_s6 = smov 32  }
  0x19   : > { %v308_v5 = vand.u32 127, %v307_v2  ;;  %256 = vrot.lane.b32.xlu0 %v1602_v4, %s1714_s4  ;;  %s1718_s7 = smov 2   ;;  %s1719_s8 = smov 16   ;;  %vm272_vm4 = vcmask 138240   ;;  %vm416_vm5 = vcmask 146432   ;;  %vm437_vm6 = vcmask 261120  }
  0x1a   : > { %v225_v6 = vld [vmem:[#allocation2 + $0x8] sm:$0xff]  ;;  %v224_v9 = vld [vmem:[#allocation2] sm:$0xff]  ;;  %s1720_s9 = smov 34   ;;  %s1721_s10 = smov 111   ;;  %vm372_vm7 = vcmask 15360   ;;  %vm654_vm8 = vcmask 908288  }
  0x1b   : > { %v227_v7 = vld [vmem:[#allocation2 + $0x18] sm:$0xff]  ;;  %v226_v10 = vld [vmem:[#allocation2 + $0x10] sm:$0xff]  ;;  %v309_v11 = vadd.s32 128, %v308_v5  ;;  %v314_v12 = vand.u32 15, %v308_v5  ;;  %s1722_s11 = smov 127   ;;  %s1723_s12 = smov 110  }
  0x1c   : > { %v229_v13 = vld [vmem:[#allocation2 + $0x28] sm:$0xff]  ;;  %262 = vrot.lane.b32.xlu1 %v1601_v3, %s1714_s4  ;;  %v233_v15 = vpack.c.bf16 %v227_v7, %v225_v6  ;;  %v228_v18 = vld [vmem:[#allocation2 + $0x20] sm:$0xff]  ;;  %v232_v19 = vpack.c.bf16 %v226_v10, %v224_v9  ;;  %s1724_s13 = smov 96   ;;  %s1725_s19 = smov 126   ;;  %vm395_vm9 = vcmask 130048   ;;  %vm507_vm10 = vcmask 1039360  }
  0x1d   : > { %v231_v14 = vld [vmem:[#allocation2 + $0x38] sm:$0xff]  ;;  %v321_v16 = vand.u32 15, %v309_v11  ;;  %v354_v17 = vadd.s32 1, %v314_v12  ;;  %258 = vrot.lane.b32.xlu0 %v1604_v8, %s1714_s4  ;;  %v230_v20 = vld [vmem:[#allocation2 + $0x30] sm:$0xff]  ;;  %v334_v24 = vadd.s32 4294967295, %v314_v12  ;;  %s1726_s20 = smov 95  }
  0x1e   : > { %v235_v23 = vpack.c.bf16 %v231_v14, %v229_v13  ;;  %v234_v28 = vpack.c.bf16 %v230_v20, %v228_v18  ;;  %s1727_s21 = smov 112   ;;  %vm458_vm11 = vcmask 277504   ;;  %s1728_s26 = smov 94   ;;  %vm707_vm12 = vcmask 900096  }
  0x1f   : > { %v335_v21 = vadd.s32 4294967295, %v321_v16  ;;  %v355_v22 = vadd.s32 1, %v321_v16  ;;  %vm358_vm0 = vcmp.lt.s32.totalorder %v354_v17, 16  ;;  %vm336_vm3 = vcmp.ge.s32.totalorder %v334_v24, 0 }
  0x20   : > { %266 = vrot.lane.b32.xlu1 %v233_v15, %s1714_s4  ;;  %v362_v27 = vsel %vm358_vm0, 1.0, %v1715_v25  ;;  %v342_v32 = vsel %vm336_vm3, 1.0, %v1715_v25  ;;  %vm760_vm13 = vcmask 785408   ;;  %vm560_vm14 = vcmask 1031168  }
  0x21   : > { %vm359_vm1 = vcmp.lt.s32.totalorder %v355_v22, 16  ;;  %vm337_vm2 = vcmp.ge.s32.totalorder %v335_v21, 0  ;;  %264 = vrot.lane.b32.xlu0 %v232_v19, %s1714_s4  ;;  %v364_v31 = vpack.c.bf16 %v362_v27, %v362_v27  ;;  %v344_v34 = vpack.c.bf16 %v342_v32, %v342_v32 }
  0x22   : > { %v363_v26 = vsel %vm359_vm1, 1.0, %v1715_v25  ;;  %v343_v30 = vsel %vm337_vm2, 1.0, %v1715_v25  ;;  %vm801_vm15 = vcmask 777216   ;;  %vm613_vm0 = vcmask 916480  }
  0x23   : > { %v365_v29 = vpack.c.bf16 %v363_v26, %v363_v26  ;;  %v345_v33 = vpack.c.bf16 %v343_v30, %v343_v30  ;;  %vm854_vm1 = vcmask 769024   ;;  %vm1043_vm2 = vcmask 523264  }
  0x24   : > { %270 = vrot.lane.b32.xlu1 %v235_v23, %s1714_s4 }
  0x25   : > { %268 = vrot.lane.b32.xlu0 %v234_v28, %s1714_s4 }
  0x28   : > { %414 = vrot.lane.b32.xlu1 %v365_v29, %s1716_s5 }
  0x29   : > { %412 = vrot.lane.b32.xlu0 %v364_v31, %s1716_s5 }
  0x2c   : > { %435 = vrot.lane.b32.xlu1 %v345_v33, %s1717_s6 }
  0x2d   : > { %433 = vrot.lane.b32.xlu0 %v344_v34, %s1717_s6 }
  0x30   : > { %370 = vrot.lane.b32.xlu1 %v365_v29, %s1718_s7 }
  0x31   : > { %368 = vrot.lane.b32.xlu0 %v364_v31, %s1718_s7 }
  0x34   : > { %393 = vrot.lane.b32.xlu1 %v345_v33, %s1719_s8 }
  0x35   : > { %391 = vrot.lane.b32.xlu0 %v344_v34, %s1719_s8 }
  0x38   : > { %454 = vrot.lane.b32.xlu1 %v364_v31, %s1720_s9 }
  0x39   : > { %456 = vrot.lane.b32.xlu0 %v365_v29, %s1720_s9 }
  0x8a   : > { %v261_v35 = vpop.permute.xlu1 %260 }
  0x8b   : > { %v257_v36 = vpop.permute.xlu0 %256  ;;  %v1816_v47 = vsel %vm272_vm4, 0, %v261_v35 }
  0x8c   : > { %v1797_v38 = vsel %vm272_vm4, 0, %v257_v36  ;;  %v348_v51 = vmul.bf16 %v344_v34, %v1816_v47 }
  0x8d   : > { %v346_v45 = vmul.bf16 %v344_v34, %v1797_v38 }
  0x8e   : > { %v263_v37 = vpop.permute.xlu1 %262 }
  0x8f   : > { %v1800_v39 = vsel %vm272_vm4, %v261_v35, %v263_v37  ;;  %v259_v40 = vpop.permute.xlu0 %258  ;;  %v1831_v55 = vsel %vm272_vm4, %v263_v37, 0 }
  0x90   : > { %v1803_v41 = vsel %vm272_vm4, %v257_v36, %v259_v40  ;;  %v1806_v42 = vsel %vm272_vm4, %v259_v40, 0  ;;  %v349_v46 = vmul.bf16 %v345_v33, %v1800_v39 }
  0x91   : > { %634 = vrot.lane.b32.xlu1 %v1806_v42, %s1721_s10  ;;  %632 = vrot.lane.b32.xlu0 %v1803_v41, %s1721_s10  ;;  %v347_v44 = vmul.bf16 %v345_v33, %v1803_v41 }
  0x92   : > { %v267_v43 = vpop.permute.xlu1 %266 }
  0x93   : > { %1056 = vmatprep.subr.bf16.mxu1 %v347_v44  ;;  %v265_v48 = vpop.permute.xlu0 %264  ;;  %v1845_v59 = vsel %vm272_vm4, %v267_v43, 0 }
  0x94   : > { %v1819_v49 = vsel %vm272_vm4, %v265_v48, %v267_v43  ;;  %1057 = vmatpush1.bf16.msra.mxu1 %v346_v45  ;;  %v1822_v50 = vsel %vm272_vm4, 0, %v265_v48 }
  0x95   : > { %638 = vrot.lane.b32.xlu1 %v1800_v39, %s1721_s10  ;;  %630 = vrot.lane.b32.xlu0 %v1797_v38, %s1721_s10  ;;  %v351_v52 = vmul.bf16 %v345_v33, %v1819_v49  ;;  %v350_v57 = vmul.bf16 %v344_v34, %v1822_v50 }
  0x96   : > { %1058 = vmatprep.subr.bf16.mxu1 %v349_v46  ;;  %v271_v53 = vpop.permute.xlu1 %270 }
  0x97   : > { %v269_v54 = vpop.permute.xlu0 %268  ;;  %v1858_v62 = vsel %vm272_vm4, %v271_v53, 0 }
  0x98   : > { %v1834_v56 = vsel %vm272_vm4, %v269_v54, %v271_v53  ;;  %1059 = vmatpush1.bf16.msra.mxu1 %v348_v51  ;;  %v1838_v58 = vsel %vm272_vm4, 0, %v269_v54 }
  0x99   : > { %636 = vrot.lane.b32.xlu1 %v1816_v47, %s1721_s10  ;;  %640 = vrot.lane.b32.xlu0 %v1831_v55, %s1721_s10  ;;  %v353_v60 = vmul.bf16 %v345_v33, %v1834_v56  ;;  %v352_v61 = vmul.bf16 %v344_v34, %v1838_v58 }
  0x9a   : > { %1060 = vmatprep.subr.bf16.mxu1 %v351_v52  ;;  %v415_v4 = vpop.permute.xlu1 %414 }
  0x9b   : > { %v413_v63 = vpop.permute.xlu0 %412  ;;  %v423_v14 = vmul.bf16 %v415_v4, %v1806_v42  ;;  %v426_v16 = vmul.bf16 %v415_v4, %v1831_v55  ;;  %v429_v19 = vmul.bf16 %v415_v4, %v1845_v59  ;;  %v432_v21 = vmul.bf16 %v415_v4, %v1858_v62 }
  0x9c   : > { %1061 = vmatpush1.bf16.msra.mxu1 %v350_v57  ;;  %v421_v0 = vmul.bf16 %v413_v63, %v1797_v38  ;;  %v424_v1 = vmul.bf16 %v413_v63, %v1816_v47  ;;  %v427_v3 = vmul.bf16 %v413_v63, %v1822_v50  ;;  %v430_v5 = vmul.bf16 %v413_v63, %v1838_v58 }
  0x9d   : > { %646 = vrot.lane.b32.xlu1 %v1845_v59, %s1721_s10  ;;  %644 = vrot.lane.b32.xlu0 %v1819_v49, %s1721_s10  ;;  %v417_v17 = vsel %vm416_vm5, %v413_v63, %v415_v4 }
  0x9e   : > { %1062 = vmatprep.subr.bf16.mxu1 %v353_v60  ;;  %v1888_v7 = vpop.permute.xlu1 %435  ;;  %v422_v18 = vmul.bf16 %v417_v17, %v1803_v41  ;;  %v425_v20 = vmul.bf16 %v417_v17, %v1800_v39  ;;  %v428_v22 = vmul.bf16 %v417_v17, %v1819_v49  ;;  %v431_v24 = vmul.bf16 %v417_v17, %v1834_v56 }
  0x9f   : > { %v1878_v2 = vpop.permute.xlu0 %433  ;;  %v444_v23 = vmul.bf16 %v1888_v7, %v1806_v42  ;;  %v447_v25 = vmul.bf16 %v1888_v7, %v1831_v55  ;;  %v450_v28 = vmul.bf16 %v1888_v7, %v1845_v59  ;;  %v453_v45 = vmul.bf16 %v1888_v7, %v1858_v62 }
  0xa0   : > { %1063 = vmatpush1.bf16.msra.mxu1 %v352_v61  ;;  %v442_v8 = vmul.bf16 %v1878_v2, %v1797_v38  ;;  %v445_v10 = vmul.bf16 %v1878_v2, %v1816_v47  ;;  %v438_v26 = vsel %vm437_vm6, %v1878_v2, %v1888_v7  ;;  %v448_v34 = vmul.bf16 %v1878_v2, %v1822_v50 }
  0xa1   : > { %642 = vrot.lane.b32.xlu0 %v1822_v50, %s1721_s10  ;;  %650 = vrot.lane.b32.xlu1 %v1834_v56, %s1721_s10  ;;  %v443_v27 = vmul.bf16 %v438_v26, %v1803_v41  ;;  %v446_v30 = vmul.bf16 %v438_v26, %v1800_v39  ;;  %v449_v32 = vmul.bf16 %v438_v26, %v1819_v49 }
  0xa2   : > { %v1900_v12 = vpop.permute.xlu1 %370  ;;  %v452_v44 = vmul.bf16 %v438_v26, %v1834_v56  ;;  %v451_v51 = vmul.bf16 %v1878_v2, %v1838_v58 }
  0xa3   : > { %v1884_v6 = vpop.permute.xlu0 %368  ;;  %v379_v13 = vmul.bf16 %v1900_v12, %v1806_v42  ;;  %v382_v15 = vmul.bf16 %v1900_v12, %v1831_v55  ;;  %v385_v36 = vmul.bf16 %v1900_v12, %v1845_v59  ;;  %v388_v57 = vmul.bf16 %v1900_v12, %v1858_v62 }
  0xa4   : > { %v377_v9 = vmul.bf16 %v1884_v6, %v1797_v38  ;;  %v380_v11 = vmul.bf16 %v1884_v6, %v1816_v47  ;;  %v373_v29 = vsel %vm372_vm7, %v1884_v6, %v1900_v12  ;;  %v383_v37 = vmul.bf16 %v1884_v6, %v1822_v50 }
  0xa5   : > { %652 = vrot.lane.b32.xlu0 %v1858_v62, %s1721_s10  ;;  %648 = vrot.lane.b32.xlu1 %v1838_v58, %s1721_s10  ;;  %v378_v31 = vmul.bf16 %v373_v29, %v1803_v41  ;;  %v381_v33 = vmul.bf16 %v373_v29, %v1800_v39  ;;  %v384_v35 = vmul.bf16 %v373_v29, %v1819_v49 }
  0xa6   : > { %v1958_v40 = vpop.permute.xlu1 %393  ;;  %v387_v52 = vmul.bf16 %v373_v29, %v1834_v56  ;;  %v386_v60 = vmul.bf16 %v1884_v6, %v1838_v58 }
  0xa7   : > { %v1960_v43 = vpop.permute.xlu0 %391 }
  0xa8   : > { %v1988_v2 = vsel %vm395_vm9, %v1960_v43, %v1958_v40 }
  0xa9   : > { %487 = vrot.lane.b32.xlu0 %v1806_v42, %s1722_s11  ;;  %485 = vrot.lane.b32.xlu1 %v1803_v41, %s1722_s11 }
  0xaa   : > { %v1969_v46 = vpop.permute.xlu1 %454 }
  0xab   : > { %v1971_v48 = vpop.permute.xlu0 %456 }
  0xad   : > { %493 = vrot.lane.b32.xlu0 %v1831_v55, %s1722_s11  ;;  %483 = vrot.lane.b32.xlu1 %v1797_v38, %s1722_s11 }
  0xb1   : > { %499 = vrot.lane.b32.xlu0 %v1845_v59, %s1722_s11  ;;  %491 = vrot.lane.b32.xlu1 %v1800_v39, %s1722_s11 }
  0xb5   : > { %505 = vrot.lane.b32.xlu0 %v1858_v62, %s1722_s11  ;;  %489 = vrot.lane.b32.xlu1 %v1816_v47, %s1722_s11 }
  0xb9   : > { %497 = vrot.lane.b32.xlu1 %v1819_v49, %s1722_s11  ;;  %683 = vrot.lane.b32.xlu0 %v421_v0, %s1723_s12 }
  0xbd   : > { %495 = vrot.lane.b32.xlu1 %v1822_v50, %s1722_s11  ;;  %689 = vrot.lane.b32.xlu0 %v424_v1, %s1723_s12 }
  0xc1   : > { %503 = vrot.lane.b32.xlu1 %v1834_v56, %s1722_s11  ;;  %695 = vrot.lane.b32.xlu0 %v427_v3, %s1723_s12 }
  0xc5   : > { %501 = vrot.lane.b32.xlu1 %v1838_v58, %s1722_s11  ;;  %701 = vrot.lane.b32.xlu0 %v430_v5, %s1723_s12  ;;  %v401_v5 = vmul.bf16 %v1988_v2, %v1803_v41 }
  0xc9   : > { %736 = vrot.lane.b32.xlu0 %v442_v8, %s1724_s13  ;;  %536 = vrot.lane.b32.xlu1 %v377_v9, %s1725_s19 }
  0xcd   : > { %742 = vrot.lane.b32.xlu0 %v445_v10, %s1724_s13  ;;  %542 = vrot.lane.b32.xlu1 %v380_v11, %s1725_s19  ;;  %v402_v10 = vmul.bf16 %v1958_v40, %v1806_v42  ;;  %v400_v11 = vmul.bf16 %v1960_v43, %v1797_v38 }
  0xd1   : > { %540 = vrot.lane.b32.xlu0 %v379_v13, %s1725_s19  ;;  %687 = vrot.lane.b32.xlu1 %v423_v14, %s1723_s12 }
  0xd5   : > { %546 = vrot.lane.b32.xlu0 %v382_v15, %s1725_s19  ;;  %693 = vrot.lane.b32.xlu1 %v426_v16, %s1723_s12 }
  0xd9   : > { %685 = vrot.lane.b32.xlu0 %v422_v18, %s1723_s12  ;;  %699 = vrot.lane.b32.xlu1 %v429_v19, %s1723_s12  ;;  %v404_v18 = vmul.bf16 %v1988_v2, %v1800_v39 }
  0xdd   : > { %691 = vrot.lane.b32.xlu0 %v425_v20, %s1723_s12  ;;  %705 = vrot.lane.b32.xlu1 %v432_v21, %s1723_s12 }
  0xe1   : > { %697 = vrot.lane.b32.xlu0 %v428_v22, %s1723_s12  ;;  %740 = vrot.lane.b32.xlu1 %v444_v23, %s1724_s13  ;;  %v405_v23 = vmul.bf16 %v1958_v40, %v1831_v55 }
  0xe5   : > { %703 = vrot.lane.b32.xlu0 %v431_v24, %s1723_s12  ;;  %746 = vrot.lane.b32.xlu1 %v447_v25, %s1724_s13  ;;  %v403_v24 = vmul.bf16 %v1960_v43, %v1816_v47 }
  0xe9   : > { %738 = vrot.lane.b32.xlu0 %v443_v27, %s1724_s13  ;;  %752 = vrot.lane.b32.xlu1 %v450_v28, %s1724_s13 }
  0xed   : > { %744 = vrot.lane.b32.xlu0 %v446_v30, %s1724_s13  ;;  %538 = vrot.lane.b32.xlu1 %v378_v31, %s1725_s19  ;;  %v407_v31 = vmul.bf16 %v1988_v2, %v1819_v49 }
  0xf1   : > { %750 = vrot.lane.b32.xlu0 %v449_v32, %s1724_s13  ;;  %544 = vrot.lane.b32.xlu1 %v381_v33, %s1725_s19  ;;  %v1607_v33 = vld [vmem:[%s2303_s1 + $0xc] ss:$20 sps:$4 sm:$0xff]  }
  0xf2   : > { %1161 = vmatprep.mubr.bf16.mxu0 %v1607_v33 }
  0xf5   : > { %748 = vrot.lane.b32.xlu0 %v448_v34, %s1724_s13  ;;  %550 = vrot.lane.b32.xlu1 %v384_v35, %s1725_s19 }
  0xf9   : > { %552 = vrot.lane.b32.xlu0 %v385_v36, %s1725_s19  ;;  %548 = vrot.lane.b32.xlu1 %v383_v37, %s1725_s19  ;;  %v408_v36 = vmul.bf16 %v1958_v40, %v1845_v59  ;;  %v406_v37 = vmul.bf16 %v1960_v43, %v1822_v50 }
  0xfd   : > { %756 = vrot.lane.b32.xlu0 %v452_v44, %s1724_s13  ;;  %758 = vrot.lane.b32.xlu1 %v453_v45, %s1724_s13 }
 0x101   : > { %754 = vrot.lane.b32.xlu0 %v451_v51, %s1724_s13  ;;  %556 = vrot.lane.b32.xlu1 %v387_v52, %s1725_s19  ;;  %v1610_v52 = vld [vmem:[%s2303_s1 + $0x4] ss:$20 sps:$4 sm:$0xff]  }
 0x102   : > { %1088 = vmatprep.mubr.bf16.mxu1 %v1610_v52  ;;  %v901_v52 = vld [vmem:[%s2304_s2 + $0x30] sm:$0xff] }
 0x103   : > { %v635_v53 = vpop.permute.xlu1 %634  ;;  %v633_v54 = vpop.permute.xlu0 %632 }
 0x104   : > { %v656_v61 = vsel %vm654_vm8, %v633_v54, %v635_v53 }
 0x105   : > { %558 = vrot.lane.b32.xlu0 %v388_v57, %s1725_s19  ;;  %554 = vrot.lane.b32.xlu1 %v386_v60, %s1725_s19  ;;  %v410_v60 = vmul.bf16 %v1988_v2, %v1834_v56 }
 0x106   : > { %1129 = vmatprep.subr.bf16.mxu0 %v656_v61 }
 0x107   : > { %v639_v63 = vpop.permute.xlu1 %638  ;;  %v631_v0 = vpop.permute.xlu0 %630 }
 0x108   : > { %v655_v1 = vsel %vm654_vm8, %v631_v0, %v633_v54 }
 0x109   : > { %779 = vrot.lane.b32.xlu0 %v1803_v41, %s1726_s20  ;;  %781 = vrot.lane.b32.xlu1 %v1806_v42, %s1726_s20 }
 0x10a   : > { %1130 = vmatpush1.bf16.msra.mxu0 %v655_v1  ;;  %v411_v1 = vmul.bf16 %v1958_v40, %v1858_v62 }
 0x10b   : > { %v637_v3 = vpop.permute.xlu1 %636  ;;  %v641_v4 = vpop.permute.xlu0 %640 }
 0x10c   : > { %v658_v6 = vsel %vm654_vm8, %v639_v63, %v641_v4  ;;  %v657_v7 = vsel %vm654_vm8, %v637_v3, %v639_v63  ;;  %v409_v3 = vmul.bf16 %v1960_v43, %v1838_v58  ;;  %v459_v4 = vsel %vm458_vm11, %v1969_v46, %v1971_v48 }
 0x10d   : > { %777 = vrot.lane.b32.xlu0 %v1797_v38, %s1726_s20  ;;  %591 = vrot.lane.b32.xlu1 %v401_v5, %s1727_s21  ;;  %v464_v40 = vmul.bf16 %v459_v4, %v1803_v41 }
 0x10e   : > { %1131 = vmatprep.subr.bf16.mxu0 %v658_v6 }
 0x10f   : > { %1132 = vmatpush1.bf16.msra.mxu0 %v657_v7  ;;  %v647_v8 = vpop.permute.xlu1 %646  ;;  %v645_v9 = vpop.permute.xlu0 %644  ;;  %v465_v7 = vmul.bf16 %v1971_v48, %v1806_v42 }
 0x110   : > { %v660_v12 = vsel %vm654_vm8, %v645_v9, %v647_v8 }
 0x111   : > { %593 = vrot.lane.b32.xlu0 %v402_v10, %s1727_s21  ;;  %589 = vrot.lane.b32.xlu1 %v400_v11, %s1727_s21  ;;  %v467_v10 = vmul.bf16 %v459_v4, %v1800_v39  ;;  %v463_v11 = vmul.bf16 %v1969_v46, %v1797_v38 }
 0x112   : > { %1133 = vmatprep.subr.bf16.mxu0 %v660_v12  ;;  %v466_v12 = vmul.bf16 %v1969_v46, %v1816_v47 }
 0x113   : > { %v651_v13 = vpop.permute.xlu1 %650  ;;  %v643_v14 = vpop.permute.xlu0 %642 }
 0x114   : > { %v659_v15 = vsel %vm654_vm8, %v643_v14, %v645_v9  ;;  %v471_v14 = vmul.bf16 %v1971_v48, %v1845_v59 }
 0x115   : > { %785 = vrot.lane.b32.xlu0 %v1800_v39, %s1726_s20  ;;  %787 = vrot.lane.b32.xlu1 %v1831_v55, %s1726_s20 }
 0x116   : > { %1134 = vmatpush1.bf16.msra.mxu0 %v659_v15  ;;  %v470_v15 = vmul.bf16 %v459_v4, %v1819_v49 }
 0x117   : > { %v649_v16 = vpop.permute.xlu1 %648  ;;  %v653_v17 = vpop.permute.xlu0 %652 }
 0x118   : > { %v662_v19 = vsel %vm654_vm8, %v651_v13, %v653_v17  ;;  %v661_v20 = vsel %vm654_vm8, %v649_v16, %v651_v13  ;;  %v468_v13 = vmul.bf16 %v1971_v48, %v1831_v55  ;;  %v473_v17 = vmul.bf16 %v459_v4, %v1834_v56 }
 0x119   : > { %783 = vrot.lane.b32.xlu0 %v1816_v47, %s1726_s20  ;;  %597 = vrot.lane.b32.xlu1 %v404_v18, %s1727_s21  ;;  %v1729_v47 = vmov 0   ;;  %v469_v18 = vmul.bf16 %v1969_v46, %v1822_v50 }
 0x11a   : > { %1135 = vmatprep.subr.bf16.mxu0 %v662_v19  ;;  %1598 = vset.pattern.permute.xlu1 %v1729_v47  ;;  %v472_v19 = vmul.bf16 %v1969_v46, %v1838_v58 }
 0x11b   : > { %1136 = vmatpush1.bf16.msra.mxu0 %v661_v20  ;;  %v486_v21 = vpop.permute.xlu1 %485  ;;  %v488_v22 = vpop.permute.xlu0 %487  ;;  %1597 = vset.pattern.permute.xlu0 %v1729_v47  ;;  %v474_v20 = vmul.bf16 %v1971_v48, %v1858_v62 }
 0x11c   : > { %v509_v25 = vsel %vm507_vm10, %v486_v21, %v488_v22 }
 0x11d   : > { %599 = vrot.lane.b32.xlu0 %v405_v23, %s1727_s21  ;;  %595 = vrot.lane.b32.xlu1 %v403_v24, %s1727_s21 }
 0x11e   : > { %1064 = vmatprep.subr.bf16.mxu1 %v509_v25  ;;  %v896_v25 = vld [vmem:[%s2304_s2 + $0x8] sm:$0xff] }
 0x11f   : > { %v484_v26 = vpop.permute.xlu1 %483  ;;  %v494_v27 = vpop.permute.xlu0 %493 }
 0x120   : > { %v508_v28 = vsel %vm507_vm10, %v484_v26, %v486_v21  ;;  %v895_v26 = vld [vmem:[%s2304_s2] sm:$0xff] }
 0x121   : > { %791 = vrot.lane.b32.xlu0 %v1819_v49, %s1726_s20  ;;  %793 = vrot.lane.b32.xlu1 %v1845_v59, %s1726_s20 }
 0x122   : > { %1065 = vmatpush1.bf16.msra.mxu1 %v508_v28 }
 0x123   : > { %v492_v29 = vpop.permute.xlu1 %491  ;;  %v500_v30 = vpop.permute.xlu0 %499 }
 0x124   : > { %v511_v32 = vsel %vm507_vm10, %v492_v29, %v494_v27 }
 0x125   : > { %789 = vrot.lane.b32.xlu0 %v1822_v50, %s1726_s20  ;;  %603 = vrot.lane.b32.xlu1 %v407_v31, %s1727_s21 }
 0x126   : > { %1066 = vmatprep.subr.bf16.mxu1 %v511_v32 }
 0x127   : > { %v490_v34 = vpop.permute.xlu1 %489  ;;  %v506_v35 = vpop.permute.xlu0 %505 }
 0x128   : > { %v510_v44 = vsel %vm507_vm10, %v490_v34, %v492_v29  ;;  %v897_v29 = vld [vmem:[%s2304_s2 + $0x10] sm:$0xff] }
 0x129   : > { %605 = vrot.lane.b32.xlu0 %v408_v36, %s1727_s21  ;;  %601 = vrot.lane.b32.xlu1 %v406_v37, %s1727_s21  ;;  %v900_v36 = vld [vmem:[%s2304_s2 + $0x28] sm:$0xff] }
 0x12a   : > { %1067 = vmatpush1.bf16.msra.mxu1 %v510_v44 }
 0x12b   : > { %v498_v45 = vpop.permute.xlu1 %497  ;;  %v2048_v51 = vpop.permute.xlu0 %683 }
 0x12c   : > { %v513_v53 = vsel %vm507_vm10, %v498_v45, %v500_v30  ;;  %v898_v30 = vld [vmem:[%s2304_s2 + $0x18] sm:$0xff] }
 0x12d   : > { %797 = vrot.lane.b32.xlu0 %v1834_v56, %s1726_s20  ;;  %799 = vrot.lane.b32.xlu1 %v1858_v62, %s1726_s20 }
 0x12e   : > { %1068 = vmatprep.subr.bf16.mxu1 %v513_v53 }
 0x12f   : > { %v496_v54 = vpop.permute.xlu1 %495  ;;  %v2058_v57 = vpop.permute.xlu0 %689 }
 0x130   : > { %v512_v61 = vsel %vm507_vm10, %v496_v54, %v498_v45 }
 0x131   : > { %795 = vrot.lane.b32.xlu0 %v1838_v58, %s1726_s20  ;;  %609 = vrot.lane.b32.xlu1 %v410_v60, %s1727_s21 }
 0x132   : > { %1069 = vmatpush1.bf16.msra.mxu1 %v512_v61  ;;  %v902_v61 = vld [vmem:[%s2304_s2 + $0x38] sm:$0xff] }
 0x133   : > { %v504_v63 = vpop.permute.xlu1 %503  ;;  %v2066_v0 = vpop.permute.xlu0 %695 }
 0x134   : > { %v515_v2 = vsel %vm507_vm10, %v504_v63, %v506_v35  ;;  %v899_v35 = vld [vmem:[%s2304_s2 + $0x20] sm:$0xff] }
 0x135   : > { %611 = vrot.lane.b32.xlu0 %v411_v1, %s1727_s21  ;;  %607 = vrot.lane.b32.xlu1 %v409_v3, %s1727_s21 }
 0x136   : > { %1070 = vmatprep.subr.bf16.mxu1 %v515_v2 }
 0x137   : > { %v502_v5 = vpop.permute.xlu1 %501  ;;  %v2077_v6 = vpop.permute.xlu0 %701 }
 0x138   : > { %v514_v43 = vsel %vm507_vm10, %v502_v5, %v504_v63 }
 0x139   : > { %834 = vrot.lane.b32.xlu1 %v465_v7, %s1728_s26  ;;  %832 = vrot.lane.b32.xlu0 %v464_v40, %s1728_s26 }
 0x13a   : > { %1071 = vmatpush1.bf16.msra.mxu1 %v514_v43 }
 0x13b   : > { %v2085_v8 = vpop.permute.xlu1 %536  ;;  %v2087_v9 = vpop.permute.xlu0 %736 }
 0x13d   : > { %838 = vrot.lane.b32.xlu1 %v467_v10, %s1728_s26  ;;  %830 = vrot.lane.b32.xlu0 %v463_v11, %s1728_s26 }
 0x13f   : > { %v2094_v41 = vpop.permute.xlu1 %542  ;;  %v2096_v42 = vpop.permute.xlu0 %742 }
 0x141   : > { %836 = vrot.lane.b32.xlu1 %v466_v12, %s1728_s26  ;;  %840 = vrot.lane.b32.xlu0 %v468_v13, %s1728_s26 }
 0x143   : > { %v688_v39 = vpop.permute.xlu1 %687  ;;  %v2104_v38 = vpop.permute.xlu0 %540 }
 0x145   : > { %846 = vrot.lane.b32.xlu1 %v471_v14, %s1728_s26  ;;  %844 = vrot.lane.b32.xlu0 %v470_v15, %s1728_s26 }
 0x147   : > { %v694_v55 = vpop.permute.xlu1 %693  ;;  %v2113_v16 = vpop.permute.xlu0 %546 }
 0x149   : > { %850 = vrot.lane.b32.xlu1 %v473_v17, %s1728_s26  ;;  %842 = vrot.lane.b32.xlu0 %v469_v18, %s1728_s26 }
 0x14b   : > { %v700_v49 = vpop.permute.xlu1 %699  ;;  %v686_v59 = vpop.permute.xlu0 %685 }
 0x14c   : > { %v709_v21 = vsel %vm707_vm12, %v686_v59, %v688_v39  ;;  %v708_v56 = vsel %vm707_vm12, %v2048_v51, %v686_v59 }
 0x14d   : > { %848 = vrot.lane.b32.xlu1 %v472_v19, %s1728_s26  ;;  %852 = vrot.lane.b32.xlu0 %v474_v20, %s1728_s26 }
 0x14e   : > { %1137 = vmatprep.subr.bf16.mxu0 %v709_v21 }
 0x14f   : > { %1138 = vmatpush1.bf16.msra.mxu0 %v708_v56  ;;  %v706_v50 = vpop.permute.xlu1 %705  ;;  %v692_v22 = vpop.permute.xlu0 %691 }
 0x150   : > { %v711_v23 = vsel %vm707_vm12, %v692_v22, %v694_v55  ;;  %v710_v58 = vsel %vm707_vm12, %v2058_v57, %v692_v22 }
 0x151   : > { %1139 = vmatprep.subr.bf16.mxu0 %v711_v23  ;;  %910 = vperm.xlu1 %1598, %v896_v25  }
 0x152   : > { %905 = vperm.xlu0 %1597, %v895_v26  }
 0x153   : > { %1140 = vmatpush1.bf16.msra.mxu0 %v710_v58  ;;  %v741_v62 = vpop.permute.xlu1 %740  ;;  %v698_v46 = vpop.permute.xlu0 %697 }
 0x154   : > { %v713_v48 = vsel %vm707_vm12, %v698_v46, %v700_v49  ;;  %v712_v24 = vsel %vm707_vm12, %v2066_v0, %v698_v46 }
 0x155   : > { %1141 = vmatprep.subr.bf16.mxu0 %v713_v48  ;;  %915 = vperm.xlu1 %1598, %v897_v29  }
 0x156   : > { %920 = vperm.xlu0 %1597, %v898_v30  }
 0x157   : > { %1142 = vmatpush1.bf16.msra.mxu0 %v712_v24  ;;  %v747_v27 = vpop.permute.xlu1 %746  ;;  %v704_v28 = vpop.permute.xlu0 %703 }
 0x158   : > { %v715_v31 = vsel %vm707_vm12, %v704_v28, %v706_v50  ;;  %v714_v32 = vsel %vm707_vm12, %v2077_v6, %v704_v28 }
 0x159   : > { %1143 = vmatprep.subr.bf16.mxu0 %v715_v31  ;;  %925 = vperm.xlu1 %1598, %v899_v35  }
 0x15a   : > { %930 = vperm.xlu0 %1597, %v900_v36  }
 0x15b   : > { %1144 = vmatpush1.bf16.msra.mxu0 %v714_v32  ;;  %v753_v33 = vpop.permute.xlu1 %752  ;;  %v739_v34 = vpop.permute.xlu0 %738 }
 0x15c   : > { %v762_v37 = vsel %vm760_vm13, %v739_v34, %v741_v62  ;;  %v761_v44 = vsel %vm760_vm13, %v2087_v9, %v739_v34 }
 0x15d   : > { %1145 = vmatprep.subr.bf16.mxu0 %v762_v37  ;;  %935 = vperm.xlu1 %1598, %v901_v52  }
 0x15e   : > { %940 = vperm.xlu0 %1597, %v902_v61  }
 0x15f   : > { %1146 = vmatpush1.bf16.msra.mxu0 %v761_v44  ;;  %v539_v45 = vpop.permute.xlu1 %538  ;;  %v745_v51 = vpop.permute.xlu0 %744 }
 0x160   : > { %v562_v53 = vsel %vm560_vm14, %v539_v45, %v2104_v38  ;;  %v764_v54 = vsel %vm760_vm13, %v745_v51, %v747_v27  ;;  %v561_v57 = vsel %vm560_vm14, %v2085_v8, %v539_v45  ;;  %v763_v60 = vsel %vm760_vm13, %v2096_v42, %v745_v51 }
 0x161   : > { %1072 = vmatprep.subr.bf16.mxu1 %v562_v53  ;;  %1147 = vmatprep.subr.bf16.mxu0 %v764_v54  ;;  %v1605_v53 = vld [vmem:[%s2303_s1 + $0x8] ss:$20 sps:$4 sm:$0xff]  }
 0x162   : > { %1073 = vmatpush1.bf16.msra.mxu1 %v561_v57  ;;  %v1611_v54 = vld [vmem:[%s2303_s1 + $0x34] ss:$20 sps:$4 sm:$0xff]  }
 0x163   : > { %1148 = vmatpush1.bf16.msra.mxu0 %v763_v60  ;;  %v545_v63 = vpop.permute.xlu1 %544  ;;  %v751_v0 = vpop.permute.xlu0 %750 }
 0x164   : > { %v564_v1 = vsel %vm560_vm14, %v545_v63, %v2113_v16  ;;  %v766_v3 = vsel %vm760_vm13, %v751_v0, %v753_v33  ;;  %v563_v2 = vsel %vm560_vm14, %v2094_v41, %v545_v63 }
 0x165   : > { %1074 = vmatprep.subr.bf16.mxu1 %v564_v1  ;;  %1149 = vmatprep.subr.bf16.mxu0 %v766_v3  ;;  %v1614_v1 = vld [vmem:[%s2303_s1 + $0x2c] ss:$20 sps:$4 sm:$0xff]  }
 0x166   : > { %1075 = vmatpush1.bf16.msra.mxu1 %v563_v2 }
 0x167   : > { %v551_v4 = vpop.permute.xlu1 %550  ;;  %v749_v5 = vpop.permute.xlu0 %748 }
 0x168   : > { %v765_v6 = vsel %vm760_vm13, %v749_v5, %v751_v0  ;;  %v1608_v0 = vld [vmem:[%s2303_s1] ss:$20 sps:$4 sm:$0xff]   ;;  %v1613_v5 = vld [vmem:[%s2303_s1 + $0x30] ss:$20 sps:$4 sm:$0xff]  }
 0x169   : > { %1150 = vmatpush1.bf16.msra.mxu0 %v765_v6  ;;  %v1617_v6 = vld [vmem:[%s2303_s1 + $0x5c] ss:$20 sps:$4 sm:$0xff]  }
 0x16b   : > { %v549_v7 = vpop.permute.xlu1 %548  ;;  %v553_v40 = vpop.permute.xlu0 %552 }
 0x16c   : > { %v566_v43 = vsel %vm560_vm14, %v551_v4, %v553_v40  ;;  %v565_v8 = vsel %vm560_vm14, %v549_v7, %v551_v4 }
 0x16d   : > { %1076 = vmatprep.subr.bf16.mxu1 %v566_v43 }
 0x16e   : > { %1077 = vmatpush1.bf16.msra.mxu1 %v565_v8  ;;  %v1616_v8 = vld [vmem:[%s2303_s1 + $0x28] ss:$20 sps:$4 sm:$0xff]  }
 0x16f   : > { %v759_v9 = vpop.permute.xlu1 %758  ;;  %v757_v10 = vpop.permute.xlu0 %756 }
 0x170   : > { %v768_v11 = vsel %vm760_vm13, %v757_v10, %v759_v9 }
 0x171   : > { %1151 = vmatprep.subr.bf16.mxu0 %v768_v11  ;;  %v1620_v11 = vld [vmem:[%s2303_s1 + $0x54] ss:$20 sps:$4 sm:$0xff]  }
 0x173   : > { %v557_v41 = vpop.permute.xlu1 %556  ;;  %v755_v42 = vpop.permute.xlu0 %754 }
 0x174   : > { %v767_v12 = vsel %vm760_vm13, %v755_v42, %v757_v10 }
 0x175   : > { %1152 = vmatpush1.bf16.msra.mxu0 %v767_v12  ;;  %v1619_v12 = vld [vmem:[%s2303_s1 + $0x58] ss:$20 sps:$4 sm:$0xff]  }
 0x177   : > { %v555_v13 = vpop.permute.xlu1 %554  ;;  %v559_v39 = vpop.permute.xlu0 %558 }
 0x178   : > { %v568_v38 = vsel %vm560_vm14, %v557_v41, %v559_v39  ;;  %v567_v14 = vsel %vm560_vm14, %v555_v13, %v557_v41  ;;  %v1623_v13 = vld [vmem:[%s2303_s1 + $0x84] ss:$20 sps:$4 sm:$0xff]  }
 0x179   : > { %1078 = vmatprep.subr.bf16.mxu1 %v568_v38 }
 0x17a   : > { %1079 = vmatpush1.bf16.msra.mxu1 %v567_v14 }
 0x17b   : > { %v782_v15 = vpop.permute.xlu1 %781  ;;  %v780_v55 = vpop.permute.xlu0 %779 }
 0x17c   : > { %v803_v16 = vsel %vm801_vm15, %v780_v55, %v782_v15  ;;  %v1622_v15 = vld [vmem:[%s2303_s1 + $0x50] ss:$20 sps:$4 sm:$0xff]  }
 0x17d   : > { %1153 = vmatprep.subr.bf16.mxu0 %v803_v16 }
 0x17f   : > { %v592_v17 = vpop.permute.xlu1 %591  ;;  %v778_v18 = vpop.permute.xlu0 %777 }
 0x180   : > { %v802_v49 = vsel %vm801_vm15, %v778_v18, %v780_v55  ;;  %v1626_v55 = vld [vmem:[%s2303_s1 + $0x7c] ss:$20 sps:$4 sm:$0xff]  }
 0x181   : > { %1154 = vmatpush1.bf16.msra.mxu0 %v802_v49  ;;  %v1625_v49 = vld [vmem:[%s2303_s1 + $0x80] ss:$20 sps:$4 sm:$0xff]  }
 0x183   : > { %v590_v59 = vpop.permute.xlu1 %589  ;;  %v594_v19 = vpop.permute.xlu0 %593 }
 0x184   : > { %v615_v20 = vsel %vm613_vm0, %v592_v17, %v594_v19  ;;  %v614_v21 = vsel %vm613_vm0, %v590_v59, %v592_v17 }
 0x185   : > { %1080 = vmatprep.subr.bf16.mxu1 %v615_v20 }
 0x186   : > { %1081 = vmatpush1.bf16.msra.mxu1 %v614_v21 }
 0x187   : > { %v788_v56 = vpop.permute.xlu1 %787  ;;  %v786_v50 = vpop.permute.xlu0 %785 }
 0x188   : > { %v805_v22 = vsel %vm801_vm15, %v786_v50, %v788_v56  ;;  %v1628_v56 = vld [vmem:[%s2303_s1 + $0x78] ss:$20 sps:$4 sm:$0xff]  }
 0x189   : > { %1155 = vmatprep.subr.bf16.mxu0 %v805_v22  ;;  %v1630_v22 = vld [vmem:[%s2303_s1 + $0x60] ss:$20 sps:$4 sm:$0xff]  }
 0x18b   : > { %v598_v23 = vpop.permute.xlu1 %597  ;;  %v784_v58 = vpop.permute.xlu0 %783 }
 0x18c   : > { %v804_v62 = vsel %vm801_vm15, %v784_v58, %v786_v50  ;;  %v1629_v50 = vld [vmem:[%s2303_s1 + $0x10] ss:$20 sps:$4 sm:$0xff]   ;;  %v1632_v58 = vld [vmem:[%s2303_s1 + $0x88] ss:$20 sps:$4 sm:$0xff]  }
 0x18d   : > { %1156 = vmatpush1.bf16.msra.mxu0 %v804_v62 }
 0x18f   : > { %v596_v46 = vpop.permute.xlu1 %595  ;;  %v600_v48 = vpop.permute.xlu0 %599 }
 0x190   : > { %v617_v24 = vsel %vm613_vm0, %v598_v23, %v600_v48  ;;  %v616_v25 = vsel %vm613_vm0, %v596_v46, %v598_v23  ;;  %v1631_v23 = vld [vmem:[%s2303_s1 + $0x38] ss:$20 sps:$4 sm:$0xff]  }
 0x191   : > { %1082 = vmatprep.subr.bf16.mxu1 %v617_v24 }
 0x192   : > { %1083 = vmatpush1.bf16.msra.mxu1 %v616_v25 }
 0x193   : > { %v794_v26 = vpop.permute.xlu1 %793  ;;  %v792_v27 = vpop.permute.xlu0 %791 }
 0x194   : > { %v807_v28 = vsel %vm801_vm15, %v792_v27, %v794_v26 }
 0x195   : > { %1157 = vmatprep.subr.bf16.mxu0 %v807_v28 }
 0x197   : > { %v604_v29 = vpop.permute.xlu1 %603  ;;  %v790_v30 = vpop.permute.xlu0 %789 }
 0x198   : > { %v806_v31 = vsel %vm801_vm15, %v790_v30, %v792_v27 }
 0x199   : > { %1158 = vmatpush1.bf16.msra.mxu0 %v806_v31 }
 0x19b   : > { %v602_v32 = vpop.permute.xlu1 %601  ;;  %v606_v33 = vpop.permute.xlu0 %605 }
 0x19c   : > { %v619_v34 = vsel %vm613_vm0, %v604_v29, %v606_v33  ;;  %v618_v35 = vsel %vm613_vm0, %v602_v32, %v604_v29 }
 0x19d   : > { %1084 = vmatprep.subr.bf16.mxu1 %v619_v34 }
 0x19e   : > { %1085 = vmatpush1.bf16.msra.mxu1 %v618_v35 }
 0x19f   : > { %v800_v36 = vpop.permute.xlu1 %799  ;;  %v798_v37 = vpop.permute.xlu0 %797 }
 0x1a0   : > { %v809_v44 = vsel %vm801_vm15, %v798_v37, %v800_v36 }
 0x1a1   : > { %1159 = vmatprep.subr.bf16.mxu0 %v809_v44 }
 0x1a3   : > { %v610_v45 = vpop.permute.xlu1 %609  ;;  %v796_v51 = vpop.permute.xlu0 %795 }
 0x1a4   : > { %v808_v52 = vsel %vm801_vm15, %v796_v51, %v798_v37 }
 0x1a5   : > { %1160 = vmatpush1.bf16.msra.mxu0 %v808_v52 }
 0x1a7   : > { %v608_v57 = vpop.permute.xlu1 %607  ;;  %v612_v60 = vpop.permute.xlu0 %611 }
 0x1a8   : > { %1162 = vmatmul.mubr.bf16.vlgmr.msra.gmra.mrb[0].mxu0 %v1605_v53  ;;  %v621_v61 = vsel %vm613_vm0, %v610_v45, %v612_v60  ;;  %v620_v63 = vsel %vm613_vm0, %v608_v57, %v610_v45 }
 0x1a9   : > { %1086 = vmatprep.subr.bf16.mxu1 %v621_v61  ;;  %1171 = vmatprep.mubr.bf16.mxu0 %v1611_v54 }
 0x1aa   : > { %1087 = vmatpush1.bf16.msra.mxu1 %v620_v63 }
 0x1ab   : > { %v835_v3 = vpop.permute.xlu1 %834  ;;  %v833_v2 = vpop.permute.xlu0 %832 }
 0x1ac   : > { %v856_v4 = vsel %vm854_vm1, %v833_v2, %v835_v3 }
 0x1ad   : > { %1089 = vmatmul.mubr.bf16.vlgmr.msra.gmra.mrb[0].mxu1 %v1608_v0  ;;  %1202 = vmatprep.subr.bf16.mxu0 %v856_v4 }
 0x1ae   : > { %1484 = vmatprep.subr.bf16.mxu1 %v856_v4  ;;  %1098 = vmatprep.mubr.bf16.mxu1 %v1614_v1 }
 0x1af   : > { %v839_v7 = vpop.permute.xlu1 %838  ;;  %v831_v40 = vpop.permute.xlu0 %830 }
 0x1b0   : > { %v855_v43 = vsel %vm854_vm1, %v831_v40, %v833_v2  ;;  %1172 = vmatmul.mubr.bf16.gmra.mrb[4].mxu0 %v1613_v5 }
 0x1b1   : > { %1203 = vmatpush1.bf16.msra.mxu0 %v855_v43  ;;  %1488 = vmatpush1.bf16.msra.mxu1 %v855_v43 }
 0x1b2   : > { %1181 = vmatprep.mubr.bf16.mxu0 %v1617_v6 }
 0x1b3   : > { %v837_v9 = vpop.permute.xlu1 %836  ;;  %v841_v10 = vpop.permute.xlu0 %840 }
 0x1b4   : > { %v857_v41 = vsel %vm854_vm1, %v837_v9, %v839_v7  ;;  %v858_v42 = vsel %vm854_vm1, %v839_v7, %v841_v10 }
 0x1b5   : > { %1099 = vmatmul.mubr.bf16.gmra.mrb[4].mxu1 %v1616_v8  ;;  %1204 = vmatprep.subr.bf16.mxu0 %v858_v42 }
 0x1b6   : > { %1485 = vmatprep.subr.bf16.mxu1 %v858_v42  ;;  %1205 = vmatpush1.bf16.msra.mxu0 %v857_v41 }
 0x1b7   : > { %1489 = vmatpush1.bf16.msra.mxu1 %v857_v41  ;;  %v847_v39 = vpop.permute.xlu1 %846  ;;  %v845_v38 = vpop.permute.xlu0 %844  ;;  %1108 = vmatprep.mubr.bf16.mxu1 %v1620_v11 }
 0x1b8   : > { %1182 = vmatmul.mubr.bf16.gmra.mrb[8].mxu0 %v1619_v12  ;;  %v860_v14 = vsel %vm854_vm1, %v845_v38, %v847_v39 }
 0x1b9   : > { %1206 = vmatprep.subr.bf16.mxu0 %v860_v14  ;;  %1486 = vmatprep.subr.bf16.mxu1 %v860_v14 }
 0x1ba   : > { %1191 = vmatprep.mubr.bf16.mxu0 %v1623_v13 }
 0x1bb   : > { %v851_v16 = vpop.permute.xlu1 %850  ;;  %v843_v17 = vpop.permute.xlu0 %842 }
 0x1bc   : > { %v859_v18 = vsel %vm854_vm1, %v843_v17, %v845_v38 }
 0x1bd   : > { %1109 = vmatmul.mubr.bf16.gmra.mrb[8].mxu1 %v1622_v15  ;;  %1207 = vmatpush1.bf16.msra.mxu0 %v859_v18 }
 0x1be   : > { %1490 = vmatpush1.bf16.msra.mxu1 %v859_v18  ;;  %1118 = vmatprep.mubr.bf16.mxu1 %v1626_v55 }
 0x1bf   : > { %v849_v59 = vpop.permute.xlu1 %848  ;;  %v853_v19 = vpop.permute.xlu0 %852 }
 0x1c0   : > { %v861_v20 = vsel %vm854_vm1, %v849_v59, %v851_v16  ;;  %1192 = vmatmul.mubr.bf16.gmra.mrb[12].mxu0 %v1625_v49  ;;  %v862_v21 = vsel %vm854_vm1, %v851_v16, %v853_v19 }
 0x1c1   : > { %1208 = vmatprep.subr.bf16.mxu0 %v862_v21  ;;  %1487 = vmatprep.subr.bf16.mxu1 %v862_v21 }
 0x1c2   : > { %1209 = vmatpush1.bf16.msra.mxu0 %v861_v20  ;;  %1491 = vmatpush1.bf16.msra.mxu1 %v861_v20 }
 0x1c3   : > { %1234 = vmatprep.mubr.bf16.mxu0 %v1729_v47 }
 0x1c5   : > { %1119 = vmatmul.mubr.bf16.gmra.mrb[12].mxu1 %v1628_v56 }
 0x1c6   : > { %1254 = vmatprep.mubr.bf16.mxu1 %v1729_v47 }
 0x1c8   : > { %1478 = vmatmul.mubr.msk.bf16.vlgmr.msra.gmra.mrb[0].mxu0 %vm1043_vm2, %v1629_v50 }
 0x1c9   : > { %1244 = vmatprep.mubr.bf16.mxu0 %v1729_v47 }
 0x1cd   : > { %1480 = vmatmul.mubr.msk.bf16.vlgmr.msra.gmra.mrb[16].mxu1 %vm1043_vm2, %v1630_v22 }
 0x1ce   : > { %1264 = vmatprep.mubr.bf16.mxu1 %v1729_v47 }
 0x1d0   : > { %1479 = vmatmul.mubr.msk.bf16.gmra.mrb[4].mxu0 %vm1043_vm2, %v1631_v23  ;;  %v911_v25 = vpop.permute.xlu1 %910 }
 0x1d1   : > { %v906_v26 = vpop.permute.xlu0 %905 }
 0x1d4   : > { %v916_v30 = vpop.permute.xlu1 %915 }
 0x1d5   : > { %1481 = vmatmul.mubr.msk.bf16.gmra.mrb[20].mxu1 %vm1043_vm2, %v1632_v58  ;;  %v2272_v32 = vpop.permute.xlu0 %920 }
 0x1d8   : > { %v926_v35 = vpop.permute.xlu1 %925 }
 0x1d9   : > { %v931_v44 = vpop.permute.xlu0 %930 }
 0x1dc   : > { %v936_v5 = vpop.permute.xlu1 %935 }
 0x1dd   : > { %v941_v40 = vpop.permute.xlu0 %940 }
 0x280   : > { %v1090_v62 = vpop.f32.mrb[0].mxu1 }
 0x281   : > { %v1092_v46 = vpop.f32.mrb[1].mxu1  ;;  %v1091_v9 = vadd.f32 %v1090_v62, %v906_v26 }
 0x282   : > { %v1094_v48 = vpop.f32.mrb[2].mxu1  ;;  %v1093_v41 = vadd.f32 %v1092_v46, %v906_v26 }
 0x283   : > { %v1096_v24 = vpop.f32.mrb[3].mxu1  ;;  %v1095_v38 = vadd.f32 %v1094_v48, %v911_v25 }
 0x284   : > { %v1097_v17 = vadd.f32 %v1096_v24, %v911_v25 }
 0x288   : > { %v1100_v27 = vpop.f32.mrb[4].mxu1 }
 0x289   : > { %v2266_v28 = vpop.f32.mrb[5].mxu1  ;;  %v1101_v58 = vadd.f32 %v1100_v27, %v916_v30 }
 0x28a   : > { %v2268_v29 = vpop.f32.mrb[6].mxu1  ;;  %v1103_v48 = vadd.f32 %v2266_v28, %v916_v30 }
 0x28b   : > { %v2270_v31 = vpop.f32.mrb[7].mxu1  ;;  %v1183_v47 = vpop.f32.mrb[8].mxu0 }
 0x28c   : > { %v1185_v33 = vpop.f32.mrb[9].mxu0 }
 0x28d   : > { %v1187_v34 = vpop.f32.mrb[10].mxu0 }
 0x28e   : > { %v1189_v36 = vpop.f32.mrb[11].mxu0 }
 0x290   : > { %v1110_v37 = vpop.f32.mrb[8].mxu1 }
 0x291   : > { %v1112_v45 = vpop.f32.mrb[9].mxu1  ;;  %v1111_v51 = vadd.f32 %v1110_v37, %v926_v35 }
 0x292   : > { %v1113_v52 = vadd.f32 %v1112_v45, %v926_v35  ;;  %v1114_v53 = vpop.f32.mrb[10].mxu1 }
 0x293   : > { %v1115_v54 = vadd.f32 %v1114_v53, %v931_v44  ;;  %v1116_v57 = vpop.f32.mrb[11].mxu1  ;;  %v1193_v60 = vpop.f32.mrb[12].mxu0  ;;  %v1184_v61 = vadd.f32 %v1183_v47, %v1111_v51  ;;  %v1105_v47 = vadd.f32 %v2268_v29, %v2272_v32 }
 0x294   : > { %v1186_v63 = vadd.f32 %v1185_v33, %v1113_v52  ;;  %v1117_v0 = vadd.f32 %v1116_v57, %v931_v44  ;;  %v1195_v1 = vpop.f32.mrb[13].mxu0 }
 0x295   : > { %v1188_v3 = vadd.f32 %v1187_v34, %v1115_v54  ;;  %v1197_v2 = vpop.f32.mrb[14].mxu0 }
 0x296   : > { %v1190_v4 = vadd.f32 %v1189_v36, %v1117_v0  ;;  %v1199_v6 = vpop.f32.mrb[15].mxu0  ;;  %v1107_v36 = vadd.f32 %v2270_v31, %v2272_v32 }
 0x298   : > { %v1120_v7 = vpop.f32.mrb[12].mxu1 }
 0x299   : > { %v1122_v43 = vpop.f32.mrb[13].mxu1  ;;  %v1121_v8 = vadd.f32 %v1120_v7, %v936_v5  ;;  %v1665_v7 = vld [vmem:[#allocation2] sm:$0xff] }
 0x29a   : > { %v1123_v10 = vadd.f32 %v1122_v43, %v936_v5  ;;  %v1124_v11 = vpop.f32.mrb[14].mxu1 }
 0x29b   : > { %v1125_v42 = vadd.f32 %v1124_v11, %v941_v40  ;;  %v1126_v12 = vpop.f32.mrb[15].mxu1  ;;  %v1236_v13 = vpop.f32.mrb[0].mxu0  ;;  %v1194_v39 = vadd.f32 %v1193_v60, %v1121_v8 }
 0x29c   : > { %v1127_v14 = vadd.f32 %v1126_v12, %v941_v40  ;;  %v1493_v15 = vadd.f32 %v1236_v13, %v1091_v9  ;;  %v1238_v55 = vpop.f32.mrb[1].mxu0  ;;  %v1196_v16 = vadd.f32 %v1195_v1, %v1123_v10  ;;  %v1666_v9 = vld [vmem:[#allocation2 + $0x8] sm:$0xff]  ;;  %v1667_v12 = vld [vmem:[#allocation2 + $0x10] sm:$0xff] }
 0x29d   : > { %v1495_v18 = vadd.f32 %v1238_v55, %v1093_v41  ;;  %v1240_v49 = vpop.f32.mrb[2].mxu0  ;;  %v1198_v59 = vadd.f32 %v1197_v2, %v1125_v42 }
 0x29e   : > { %1633 = vtanh.f32 %v1493_v15  ;;  %v1497_v19 = vadd.f32 %v1240_v49, %v1095_v38  ;;  %v1242_v20 = vpop.f32.mrb[3].mxu0  ;;  %v1200_v21 = vadd.f32 %v1199_v6, %v1127_v14 }
 0x29f   : > { %1635 = vtanh.f32 %v1495_v18  ;;  %v1499_v56 = vadd.f32 %v1242_v20, %v1097_v17  ;;  %v1668_v18 = vld [vmem:[#allocation2 + $0x18] sm:$0xff] }
 0x2a0   : > { %1637 = vtanh.f32 %v1497_v19  ;;  %v1256_v50 = vpop.f32.mrb[16].mxu1 }
 0x2a1   : > { %1639 = vtanh.f32 %v1499_v56  ;;  %v1257_v22 = vadd.f32 %v1256_v50, %v1184_v61  ;;  %v1258_v23 = vpop.f32.mrb[17].mxu1 }
 0x2a2   : > { %v1259_v62 = vadd.f32 %v1258_v23, %v1186_v63  ;;  %v1260_v46 = vpop.f32.mrb[18].mxu1 }
 0x2a3   : > { %1641 = vtanh.f32 %v1257_v22  ;;  %v1261_v24 = vadd.f32 %v1260_v46, %v1188_v3  ;;  %v1246_v25 = vpop.f32.mrb[4].mxu0  ;;  %v1262_v26 = vpop.f32.mrb[19].mxu1 }
 0x2a4   : > { %1643 = vtanh.f32 %v1259_v62  ;;  %v1501_v33 = vadd.f32 %v1246_v25, %v1101_v58  ;;  %v1263_v34 = vadd.f32 %v1262_v26, %v1190_v4  ;;  %v1248_v35 = vpop.f32.mrb[5].mxu0 }
 0x2a5   : > { %1645 = vtanh.f32 %v1261_v24  ;;  %v1503_v27 = vadd.f32 %v1248_v35, %v1103_v48  ;;  %v1250_v37 = vpop.f32.mrb[6].mxu0  ;;  %v1669_v24 = vld [vmem:[#allocation2 + $0x20] sm:$0xff] }
 0x2a6   : > { %1647 = vtanh.f32 %v1501_v33  ;;  %v1505_v44 = vadd.f32 %v1250_v37, %v1105_v47  ;;  %v1252_v28 = vpop.f32.mrb[7].mxu0  ;;  %v1670_v33 = vld [vmem:[#allocation2 + $0x28] sm:$0xff]  ;;  %v1671_v37 = vld [vmem:[#allocation2 + $0x30] sm:$0xff] }
 0x2a7   : > { %1649 = vtanh.f32 %v1263_v34  ;;  %v1507_v30 = vadd.f32 %v1252_v28, %v1107_v36 }
 0x2a8   : > { %v1634_v45 = vpop.eup %1633  ;;  %1651 = vtanh.f32 %v1503_v27  ;;  %v1266_v51 = vpop.f32.mrb[20].mxu1 }
 0x2a9   : > { %v1636_v52 = vpop.eup %1635  ;;  %1653 = vtanh.f32 %v1505_v44  ;;  %v1267_v29 = vadd.f32 %v1266_v51, %v1194_v39  ;;  %v1268_v53 = vpop.f32.mrb[21].mxu1  ;;  %v1291_v57 = vmul.f32 0.5, %v1634_v45  ;;  %v1672_v45 = vld [vmem:[#allocation2 + $0x38] sm:$0xff] }
 0x2aa   : > { %v1638_v54 = vpop.eup %1637  ;;  %1655 = vtanh.f32 %v1507_v30  ;;  %v1269_v60 = vadd.f32 %v1268_v53, %v1196_v16  ;;  %v1270_v31 = vpop.f32.mrb[22].mxu1  ;;  %v1292_v61 = vmul.f32 0.5, %v1636_v52 }
 0x2ab   : > { %v1640_v32 = vpop.eup %1639  ;;  %1657 = vtanh.f32 %v1267_v29  ;;  %v1271_v63 = vadd.f32 %v1270_v31, %v1198_v59  ;;  %v1272_v0 = vpop.f32.mrb[23].mxu1  ;;  %v1293_v1 = vmul.f32 0.5, %v1638_v54  ;;  %v1299_v6 = vadd.f32 0.5, %v1291_v57 }
 0x2ac   : > { %1659 = vtanh.f32 %v1269_v60  ;;  %v1273_v3 = vadd.f32 %v1272_v0, %v1200_v21  ;;  %v1294_v4 = vmul.f32 0.5, %v1640_v32  ;;  %v1300_v8 = vadd.f32 0.5, %v1292_v61 }
 0x2ad   : > { %v1642_v2 = vpop.eup %1641  ;;  %1661 = vtanh.f32 %v1271_v63  ;;  %v1301_v41 = vadd.f32 0.5, %v1293_v1 }
 0x2ae   : > { %v1644_v5 = vpop.eup %1643  ;;  %v1307_v40 = vsub.f32 %v1642_v2, %v1665_v7  ;;  %1663 = vtanh.f32 %v1273_v3  ;;  %v1302_v38 = vadd.f32 0.5, %v1294_v4 }
 0x2af   : > { %v1646_v43 = vpop.eup %1645  ;;  %v1308_v10 = vsub.f32 %v1644_v5, %v1666_v9 }
 0x2b0   : > { %v1648_v11 = vpop.eup %1647  ;;  %v1315_v42 = vmul.f32 %v1307_v40, %v1299_v6  ;;  %v1309_v13 = vsub.f32 %v1646_v43, %v1667_v12 }
 0x2b1   : > { %v1650_v39 = vpop.eup %1649  ;;  %v1316_v14 = vmul.f32 %v1308_v10, %v1300_v8  ;;  %v1295_v17 = vmul.f32 0.5, %v1648_v11 }
 0x2b2   : > { %v1652_v15 = vpop.eup %1651  ;;  %v1323_v55 = vadd.f32 %v1665_v7, %v1315_v42  ;;  %v1317_v16 = vmul.f32 %v1309_v13, %v1301_v41  ;;  %v1310_v49 = vsub.f32 %v1650_v39, %v1668_v18 }
 0x2b3   : > { %v1654_v59 = vpop.eup %1653  ;;  %v1324_v19 = vadd.f32 %v1666_v9, %v1316_v14  ;;  %v1296_v20 = vmul.f32 0.5, %v1652_v15  ;;  %v1303_v46 = vadd.f32 0.5, %v1295_v17 }
 0x2b4   : > { %v1656_v21 = vpop.eup %1655  ;;  %1331 = vst [vmem:[#allocation2] sm:$0xff] %v1323_v55  ;;  %1339 = vst [vmem:[%s1786_s30] sm:$0xff] %v1323_v55  ;;  %v1325_v56 = vadd.f32 %v1667_v12, %v1317_v16  ;;  %v1318_v50 = vmul.f32 %v1310_v49, %v1302_v38  ;;  %v1297_v22 = vmul.f32 0.5, %v1654_v59 }
 0x2b5   : > { %v1658_v23 = vpop.eup %1657  ;;  %1332 = vst [vmem:[#allocation2 + $0x8] sm:$0xff] %v1324_v19  ;;  %1340 = vst [vmem:[%s1786_s30 + $0x8] sm:$0xff] %v1324_v19  ;;  %v1298_v58 = vmul.f32 0.5, %v1656_v21  ;;  %v1304_v47 = vadd.f32 0.5, %v1296_v20 }
 0x2b6   : > { %v1660_v62 = vpop.eup %1659  ;;  %1333 = vst [vmem:[#allocation2 + $0x10] sm:$0xff] %v1325_v56  ;;  %1341 = vst [vmem:[%s1786_s30 + $0x10] sm:$0xff] %v1325_v56  ;;  %v1326_v48 = vadd.f32 %v1668_v18, %v1318_v50  ;;  %v1311_v25 = vsub.f32 %v1658_v23, %v1669_v24  ;;  %v1305_v36 = vadd.f32 0.5, %v1297_v22 }
 0x2b7   : > { %v1662_v26 = vpop.eup %1661  ;;  %v1312_v34 = vsub.f32 %v1660_v62, %v1670_v33  ;;  %v1306_v28 = vadd.f32 0.5, %v1298_v58 }
 0x2b8   : > { %v1664_v35 = vpop.eup %1663  ;;  %1334 = vst [vmem:[#allocation2 + $0x18] sm:$0xff] %v1326_v48  ;;  %1342 = vst [vmem:[%s1786_s30 + $0x18] sm:$0xff] %v1326_v48  ;;  %v1319_v27 = vmul.f32 %v1311_v25, %v1303_v46  ;;  %v1313_v44 = vsub.f32 %v1662_v26, %v1671_v37 }
 0x2b9   : > { %v1320_v30 = vmul.f32 %v1312_v34, %v1304_v47  ;;  %v1314_v51 = vsub.f32 %v1664_v35, %v1672_v45 }
 0x2ba   : > { %v1327_v52 = vadd.f32 %v1669_v24, %v1319_v27  ;;  %v1321_v29 = vmul.f32 %v1313_v44, %v1305_v36 }
 0x2bb   : > { %v1328_v53 = vadd.f32 %v1670_v33, %v1320_v30  ;;  %v1322_v54 = vmul.f32 %v1314_v51, %v1306_v28 }
 0x2bc   : > { %1335 = vst [vmem:[#allocation2 + $0x20] sm:$0xff] %v1327_v52  ;;  %1343 = vst [vmem:[%s1786_s30 + $0x20] sm:$0xff] %v1327_v52  ;;  %v1329_v57 = vadd.f32 %v1671_v37, %v1321_v29 }
 0x2bd   : > { %1336 = vst [vmem:[#allocation2 + $0x28] sm:$0xff] %v1328_v53  ;;  %1344 = vst [vmem:[%s1786_s30 + $0x28] sm:$0xff] %v1328_v53  ;;  %v1330_v60 = vadd.f32 %v1672_v45, %v1322_v54 }
 0x2be   : > { %1337 = vst [vmem:[#allocation2 + $0x30] sm:$0xff] %v1329_v57  ;;  %1345 = vst [vmem:[%s1786_s30 + $0x30] sm:$0xff] %v1329_v57 }
 0x2bf   : > { %1338 = vst [vmem:[#allocation2 + $0x38] sm:$0xff] %v1330_v60  ;;  %1346 = vst [vmem:[%s1786_s30 + $0x38] sm:$0xff] %v1330_v60 }
 0x2c0 PF: > { %s13_s16 = sadd.s32 1, %s1711_s16   ;;  %s2306_s12 = smov %s1703_s14 }
 0x2c1   : > { %p10_p8 = scmp.ge.s32.totalorder %s13_s16, 18   ;;  %s2307_s13 = smov %s1707_s15 }
 0x2c2   : > { %s2308_s14 = smov %s2311_s17  ;;  %s2309_s15 = smov %s2315_s18 }
 0x2c3   :  { %12 = sbr.rel (!%p10_p8) target bundleno = 3 (0x3), region = 66 }

</bundles_post_ra>
